<compile_context>
chip_gen: v7x
topology: tpu7x:2x2x1
jax: 0.10.0
libtpu: 0.0.40
codegen_flags: <defaults>
</compile_context>

<pallas_src>
import functools

import jax
import jax.numpy as jnp
from jax import lax
from jax.experimental import pallas as pl
from jax.experimental.pallas import tpu as pltpu

LANES = 128


def _round_up(x, m):
    return ((x + m - 1) // m) * m


# ------------------------------ fused Pallas kernel ----------------------------

def _fused_forward_kernel(x_ref, w_ref, o_ref, *, hidden, seq_len, in_pad,
                          off_wc, off_wl, off_wih, off_whh, off_wd, off_bias):
    H = hidden
    G = 4 * H                                   # gate vector width (== 128 lanes)

    def rows(r0, n):                            # tile-aligned static sub-view of the slab
        return w_ref[r0:r0 + n, :]

    btile = w_ref[off_bias:off_bias + 8, :]     # all 6 bias rows in one aligned (8,128) tile

    def bias_row(j):
        return btile[j:j + 1, :]                # (1, 128)

    x = x_ref[...]                              # (Tp, in_pad)

    # --- 3 CNN branches fused: conv-as-matmul -> ReLU, then the three branch Linear
    #     layers merged into one accumulated block-diagonal matmul (no lane concat). ---
    acc = jnp.zeros((x.shape[0], LANES), jnp.float32)
    for b in range(3):
        wc = rows(off_wc + b * in_pad, in_pad)                       # (in_pad, 128)
        conv = jnp.maximum(
            jnp.dot(x, wc, preferred_element_type=jnp.float32) + bias_row(b), 0.0)
        wl = rows(off_wl + b * LANES, LANES)                         # (128, 128)
        acc = acc + jnp.dot(conv, wl, preferred_element_type=jnp.float32)
    lstm_in = jnp.tanh(acc + bias_row(3))                            # (Tp, 128)

    # --- LSTM: input projection hoisted out of the recurrence. ---
    wih = rows(off_wih, LANES)                                       # (128, 4H), gate-scaled
    pre_gates = (jnp.dot(lstm_in, wih, preferred_element_type=jnp.float32)
                 + bias_row(4))                                      # (Tp, 4H)
    whh = rows(off_whh, H)                                           # (H, 4H), gate-scaled

    # tanh-only gates: sigmoid(z) = 0.5*tanh(z/2) + 0.5; the 1/2 is pre-folded into the
    # i/f/o columns of wih/whh/bias, so one full-width tanh + a per-lane affine suffices.
    lane = lax.broadcasted_iota(jnp.int32, (1, G), 1)
    is_g = (lane >= 2 * H) & (lane < 3 * H)
    g_scale = jnp.where(is_g, 1.0, 0.5).astype(jnp.float32)
    g_shift = jnp.where(is_g, 0.0, 0.5).astype(jnp.float32)

    h = jnp.zeros((1, H), jnp.float32)
    c = jnp.zeros((1, H), jnp.float32)
    for t in range(seq_len):                                         # static unroll
        z = pre_gates[t:t + 1, :] + jnp.dot(h, whh,
                                            preferred_element_type=jnp.float32)
        a = jnp.tanh(z) * g_scale + g_shift                          # i,f,o: sigmoid; g: tanh
        i_g = a[:, 0:H]                                              # PyTorch order: i,f,g,o
        f_g = a[:, H:2 * H]
        g_g = a[:, 2 * H:3 * H]
        o_g = a[:, 3 * H:4 * H]
        c = f_g * c + i_g * g_g
        h = o_g * jnp.tanh(c)

    # --- final Dense + tanh on the last hidden state (lane-dense padded to 128). ---
    wd = rows(off_wd, H)                                             # (H, 128)
    o_ref[...] = jnp.tanh(
        jnp.dot(h, wd, preferred_element_type=jnp.float32) + bias_row(5))


# ---------------------- one-time weight packing + jitted wrapper ----------------

def _conv_as_dense(conv_w, conv_b, L):
    """Lower Conv1d(k, stride=1) to (C_in*L, C_out*Lout) dense weights so that
    x_flat @ W + b yields the conv output in PyTorch's flatten order (c*Lout + l)."""
    C_out, C_in, K = conv_w.shape
    Lout = L - K + 1
    c, ci, k, l = jnp.meshgrid(jnp.arange(C_out), jnp.arange(C_in),
                               jnp.arange(K), jnp.arange(Lout), indexing="ij")
    rows = (ci * L + l + k).ravel()
    cols = (c * Lout + l).ravel()
    vals = conv_w[c, ci, k].ravel()
    W = jnp.zeros((C_in * L, C_out * Lout), jnp.float32).at[rows, cols].set(vals)
    b = jnp.repeat(conv_b, Lout).astype(jnp.float32)                 # (C_out*Lout,)
    return W, b


def build_forward(params, *, hidden, L_ae, L_mic, C_f, L_f, n_out=125):
    """One-time weight preprocessing -> (weight slab, jitted forward fn)."""
    H = hidden
    assert 4 * H == LANES, "packed layout assumes hidden=32 (4H == 128 lanes)"

    in_widths = (L_ae, L_mic, C_f * L_f)
    in_offsets = (0, L_ae, L_ae + L_mic)
    in_real = sum(in_widths)
    in_pad = _round_up(in_real, LANES)

    feat = params["ae"][2].shape[0]              # per-branch Linear out (16)
    conv_out = params["ae"][2].shape[1]          # C_out * Lout (128)
    assert conv_out <= LANES and 3 * feat <= LANES

    branch_keys = ("ae", "mic", "force")
    branch_L = (L_ae, L_mic, L_f)

    wc_blocks, wl_blocks, bc_rows = [], [], []
    b_lin = jnp.zeros((LANES,), jnp.float32)
    for b, (key, L) in enumerate(zip(branch_keys, branch_L)):
        conv_w, conv_b, lin_w, lin_b = params[key]
        Wc, bc = _conv_as_dense(conv_w, conv_b, L)                   # (C_in*L, conv_out)
        blk = jnp.zeros((in_pad, LANES), jnp.float32)
        blk = blk.at[in_offsets[b]:in_offsets[b] + Wc.shape[0], :conv_out].set(Wc)
        wc_blocks.append(blk)
        bc_rows.append(jnp.zeros((LANES,), jnp.float32).at[:conv_out].set(bc))
        wl = jnp.zeros((LANES, LANES), jnp.float32)                  # block-diag Linear
        wl = wl.at[:conv_out, b * feat:(b + 1) * feat].set(lin_w.T.astype(jnp.float32))
        wl_blocks.append(wl)
        b_lin = b_lin.at[b * feat:(b + 1) * feat].set(lin_b.astype(jnp.float32))

    # Fold sigmoid(z)=0.5*tanh(z/2)+0.5 into the i/f/o gate columns (PyTorch order i,f,g,o).
    col_scale = jnp.concatenate([jnp.full((H,), 0.5), jnp.full((H,), 0.5),
                                 jnp.full((H,), 1.0), jnp.full((H,), 0.5)]
                                ).astype(jnp.float32)

    input_size = 3 * feat
    wih = (jnp.zeros((LANES, LANES), jnp.float32)
           .at[:input_size, :].set(params["wih"].T.astype(jnp.float32))
           * col_scale[None, :])
    whh = params["whh"].T.astype(jnp.float32) * col_scale[None, :]   # (H, 4H)
    b_lstm = (params["bih"] + params["bhh"]).astype(jnp.float32) * col_scale

    wd = jnp.zeros((H, LANES), jnp.float32).at[:, :n_out].set(
        params["dense_w"].T.astype(jnp.float32))
    b_dense = jnp.zeros((LANES,), jnp.float32).at[:n_out].set(
        params["dense_b"].astype(jnp.float32))

    zero_row = jnp.zeros((LANES,), jnp.float32)
    bias_tile = jnp.stack(bc_rows + [b_lin, b_lstm, b_dense, zero_row, zero_row])  # (8,128)

    off_wc = 0
    off_wl = off_wc + 3 * in_pad
    off_wih = off_wl + 3 * LANES
    off_whh = off_wih + LANES
    off_wd = off_whh + H
    off_bias = off_wd + H
    w_slab = jnp.concatenate(wc_blocks + wl_blocks + [wih, whh, wd, bias_tile], axis=0)
    assert w_slab.shape == (off_bias + 8, LANES)

    vmem_spec = pl.BlockSpec(memory_space=pltpu.MemorySpace.VMEM)

    @jax.jit
    def forward(w_slab, AE, Mic, Forces):
        T = AE.shape[0]
        Tp = _round_up(T, 8)
        f_flat = jnp.transpose(Forces, (1, 0, 2)).reshape(T, -1)
        x = jnp.concatenate([AE.astype(jnp.float32), Mic.astype(jnp.float32),
                             f_flat.astype(jnp.float32)], axis=1)     # (T, in_real)
        x = jnp.pad(x, ((0, Tp - T), (0, in_pad - in_real)))          # (Tp, in_pad)
        out = pl.pallas_call(
            functools.partial(
                _fused_forward_kernel, hidden=H, seq_len=T, in_pad=in_pad,
                off_wc=off_wc, off_wl=off_wl, off_wih=off_wih,
                off_whh=off_whh, off_wd=off_wd, off_bias=off_bias),
            out_shape=jax.ShapeDtypeStruct((1, LANES), jnp.float32),
            in_specs=[vmem_spec, vmem_spec],
            out_specs=vmem_spec,
        )(x, w_slab)
        return out[:, :n_out]                                         # (1, 125)

    return w_slab, forward


# --------------------------- pure-JAX reference --------------------------------

def _im2col(x, K, stride):
    T, C, L = x.shape
    Lout = (L - K) // stride + 1
    idx = jnp.arange(Lout)[:, None] * stride + jnp.arange(K)[None, :]
    patches = x[:, :, idx]                                            # (T, C, Lout, K)
    patches = jnp.transpose(patches, (0, 2, 1, 3)).reshape(T * Lout, C * K)
    return patches, Lout


def forward_ref(params, AE, Mic, Forces, hidden, K=3, stride=1):
    def branch(x, conv_w, conv_b, lin_w, lin_b):
        T, C_in, _ = x.shape
        C_out = conv_w.shape[0]
        patches, Lout = _im2col(x, K, stride)
        y = jnp.maximum(patches @ conv_w.reshape(C_out, C_in * K).T + conv_b[None, :], 0.0)
        feat = y.reshape(T, Lout, C_out).transpose(0, 2, 1).reshape(T, C_out * Lout)
        return jnp.tanh(feat @ lin_w.T + lin_b[None, :])

    ae_feat = branch(AE[:, None, :], *params["ae"])
    mic_feat = branch(Mic[:, None, :], *params["mic"])
    f_feat = branch(jnp.transpose(Forces, (1, 0, 2)), *params["force"])
    x = jnp.concatenate([ae_feat, mic_feat, f_feat], axis=1)

    H = hidden
    wih, whh, bih, bhh = params["wih"], params["whh"], params["bih"], params["bhh"]

    def step(carry, x_t):
        h, c = carry
        gates = x_t @ wih.T + bih + h @ whh.T + bhh
        i_g = jax.nn.sigmoid(gates[0:H])
        f_g = jax.nn.sigmoid(gates[H:2 * H])
        g_g = jnp.tanh(gates[2 * H:3 * H])
        o_g = jax.nn.sigmoid(gates[3 * H:4 * H])
        c_new = f_g * c + i_g * g_g
        h_new = o_g * jnp.tanh(c_new)
        return (h_new, c_new), h_new

    (h_last, _), _ = lax.scan(step, (jnp.zeros((H,)), jnp.zeros((H,))), x)
    return jnp.tanh(h_last[None, :] @ params["dense_w"].T + params["dense_b"][None, :])


# ----------------------------------- main ---------------------------------------

if __name__ == "__main__":
    T = 8               # tillTimeT
    L = 34              # signal length (AE / Mic / Forces)
    K = 3               # conv kernel size
    C_OUT = 4           # conv out channels
    C_F = 3             # Forces channels
    LOUT = L - K + 1    # 32
    FEAT = 16           # per-branch linear output
    INPUT_SIZE = 3 * FEAT   # 48
    HIDDEN = 32
    N_OUT = 125

    key = jax.random.PRNGKey(0)
    ks = jax.random.split(key, 20)

    def u(k, shape, fan_in):
        bound = 1.0 / jnp.sqrt(jnp.float32(fan_in))
        return jax.random.uniform(k, shape, jnp.float32, -bound, bound)

    params = {
        "ae": (u(ks[0], (C_OUT, 1, K), 1 * K), u(ks[1], (C_OUT,), 1 * K),
               u(ks[2], (FEAT, C_OUT * LOUT), C_OUT * LOUT), u(ks[3], (FEAT,), C_OUT * LOUT)),
        "mic": (u(ks[4], (C_OUT, 1, K), 1 * K), u(ks[5], (C_OUT,), 1 * K),
                u(ks[6], (FEAT, C_OUT * LOUT), C_OUT * LOUT), u(ks[7], (FEAT,), C_OUT * LOUT)),
        "force": (u(ks[8], (C_OUT, C_F, K), C_F * K), u(ks[9], (C_OUT,), C_F * K),
                  u(ks[10], (FEAT, C_OUT * LOUT), C_OUT * LOUT), u(ks[11], (FEAT,), C_OUT * LOUT)),
        "wih": u(ks[12], (4 * HIDDEN, INPUT_SIZE), HIDDEN),
        "whh": u(ks[13], (4 * HIDDEN, HIDDEN), HIDDEN),
        "bih": u(ks[14], (4 * HIDDEN,), HIDDEN),
        "bhh": u(ks[15], (4 * HIDDEN,), HIDDEN),
        "dense_w": u(ks[16], (N_OUT, HIDDEN), HIDDEN),
        "dense_b": u(ks[17], (N_OUT,), HIDDEN),
    }

    ik = jax.random.split(jax.random.PRNGKey(1), 3)
    AE = jax.random.normal(ik[0], (T, L), jnp.float32)
    Mic = jax.random.normal(ik[1], (T, L), jnp.float32)
    Forces = jax.random.normal(ik[2], (C_F, T, L), jnp.float32)

    # One-time weight preprocessing / packing (hoisted out of the per-call path).
    w_slab, forward = build_forward(params, hidden=HIDDEN, L_ae=L, L_mic=L,
                                    C_f=C_F, L_f=L, n_out=N_OUT)

    out = jax.block_until_ready(forward(w_slab, AE, Mic, Forces))
    ref = jax.block_until_ready(forward_ref(params, AE, Mic, Forces, HIDDEN, K))

    assert out.shape == (1, N_OUT), out.shape
    assert jnp.allclose(out, ref, atol=2e-4, rtol=2e-4), float(jnp.max(jnp.abs(out - ref)))
    print("KERNEL_OK")
</pallas_src>

<mosaic_0001>
module attributes {stable_mosaic.version = 11 : i64} {
  func.func @_fused_forward_kernel(%arg0: memref<8x256xf32, #tpu.memory_space<vmem>>, %arg1: memref<1352x128xf32, #tpu.memory_space<vmem>>, %arg2: memref<1x128xf32, #tpu.memory_space<vmem>>) attributes {dimension_semantics = [], scalar_prefetch = 0 : i64, scratch_operands = 0 : i64, tpu.core_type = #tpu.core_type<tc>} {
    %c1344 = arith.constant 1344 : index
    %c0 = arith.constant 0 : index
    %0 = vector.load %arg1[%c1344, %c0] : memref<1352x128xf32, #tpu.memory_space<vmem>>, vector<8x128xf32>
    %c0_0 = arith.constant 0 : index
    %c0_1 = arith.constant 0 : index
    %1 = vector.load %arg0[%c0_0, %c0_1] : memref<8x256xf32, #tpu.memory_space<vmem>>, vector<8x256xf32>
    %cst = arith.constant 0.000000e+00 : f32
    %2 = vector.broadcast %cst : f32 to vector<8x128xf32>
    %c0_2 = arith.constant 0 : index
    %c0_3 = arith.constant 0 : index
    %3 = vector.load %arg1[%c0_2, %c0_3] : memref<1352x128xf32, #tpu.memory_space<vmem>>, vector<256x128xf32>
    %cst_4 = arith.constant dense<0.000000e+00> : vector<8x128xf32>
    %4 = tpu.matmul %1, %3, %cst_4 {dimension_numbers = #tpu.dot_dimension_numbers<[1], [0], [0], [1], [0, 0, 1, 1], [], []>} : vector<8x256xf32>, vector<256x128xf32>, vector<8x128xf32> -> vector<8x128xf32>
    %5 = vector.extract_strided_slice %0 {offsets = [0, 0], sizes = [1, 128], strides = [1, 1]} : vector<8x128xf32> to vector<1x128xf32>
    %6 = vector.broadcast %5 : vector<1x128xf32> to vector<8x128xf32>
    %7 = arith.addf %4, %6 : vector<8x128xf32>
    %cst_5 = arith.constant 0.000000e+00 : f32
    %8 = vector.broadcast %cst_5 : f32 to vector<8x128xf32>
    %9 = arith.maximumf %7, %8 : vector<8x128xf32>
    %c768 = arith.constant 768 : index
    %c0_6 = arith.constant 0 : index
    %10 = vector.load %arg1[%c768, %c0_6] : memref<1352x128xf32, #tpu.memory_space<vmem>>, vector<128x128xf32>
    %cst_7 = arith.constant dense<0.000000e+00> : vector<8x128xf32>
    %11 = tpu.matmul %9, %10, %cst_7 {dimension_numbers = #tpu.dot_dimension_numbers<[1], [0], [0], [1], [0, 0, 1, 1], [], []>} : vector<8x128xf32>, vector<128x128xf32>, vector<8x128xf32> -> vector<8x128xf32>
    %12 = arith.addf %2, %11 : vector<8x128xf32>
    %c256 = arith.constant 256 : index
    %c0_8 = arith.constant 0 : index
    %13 = vector.load %arg1[%c256, %c0_8] : memref<1352x128xf32, #tpu.memory_space<vmem>>, vector<256x128xf32>
    %cst_9 = arith.constant dense<0.000000e+00> : vector<8x128xf32>
    %14 = tpu.matmul %1, %13, %cst_9 {dimension_numbers = #tpu.dot_dimension_numbers<[1], [0], [0], [1], [0, 0, 1, 1], [], []>} : vector<8x256xf32>, vector<256x128xf32>, vector<8x128xf32> -> vector<8x128xf32>
    %15 = vector.extract_strided_slice %0 {offsets = [1, 0], sizes = [1, 128], strides = [1, 1]} : vector<8x128xf32> to vector<1x128xf32>
    %16 = vector.broadcast %15 : vector<1x128xf32> to vector<8x128xf32>
    %17 = arith.addf %14, %16 : vector<8x128xf32>
    %cst_10 = arith.constant 0.000000e+00 : f32
    %18 = vector.broadcast %cst_10 : f32 to vector<8x128xf32>
    %19 = arith.maximumf %17, %18 : vector<8x128xf32>
    %c896 = arith.constant 896 : index
    %c0_11 = arith.constant 0 : index
    %20 = vector.load %arg1[%c896, %c0_11] : memref<1352x128xf32, #tpu.memory_space<vmem>>, vector<128x128xf32>
    %cst_12 = arith.constant dense<0.000000e+00> : vector<8x128xf32>
    %21 = tpu.matmul %19, %20, %cst_12 {dimension_numbers = #tpu.dot_dimension_numbers<[1], [0], [0], [1], [0, 0, 1, 1], [], []>} : vector<8x128xf32>, vector<128x128xf32>, vector<8x128xf32> -> vector<8x128xf32>
    %22 = arith.addf %12, %21 : vector<8x128xf32>
    %c512 = arith.constant 512 : index
    %c0_13 = arith.constant 0 : index
    %23 = vector.load %arg1[%c512, %c0_13] : memref<1352x128xf32, #tpu.memory_space<vmem>>, vector<256x128xf32>
    %cst_14 = arith.constant dense<0.000000e+00> : vector<8x128xf32>
    %24 = tpu.matmul %1, %23, %cst_14 {dimension_numbers = #tpu.dot_dimension_numbers<[1], [0], [0], [1], [0, 0, 1, 1], [], []>} : vector<8x256xf32>, vector<256x128xf32>, vector<8x128xf32> -> vector<8x128xf32>
    %25 = vector.extract_strided_slice %0 {offsets = [2, 0], sizes = [1, 128], strides = [1, 1]} : vector<8x128xf32> to vector<1x128xf32>
    %26 = vector.broadcast %25 : vector<1x128xf32> to vector<8x128xf32>
    %27 = arith.addf %24, %26 : vector<8x128xf32>
    %cst_15 = arith.constant 0.000000e+00 : f32
    %28 = vector.broadcast %cst_15 : f32 to vector<8x128xf32>
    %29 = arith.maximumf %27, %28 : vector<8x128xf32>
    %c1024 = arith.constant 1024 : index
    %c0_16 = arith.constant 0 : index
    %30 = vector.load %arg1[%c1024, %c0_16] : memref<1352x128xf32, #tpu.memory_space<vmem>>, vector<128x128xf32>
    %cst_17 = arith.constant dense<0.000000e+00> : vector<8x128xf32>
    %31 = tpu.matmul %29, %30, %cst_17 {dimension_numbers = #tpu.dot_dimension_numbers<[1], [0], [0], [1], [0, 0, 1, 1], [], []>} : vector<8x128xf32>, vector<128x128xf32>, vector<8x128xf32> -> vector<8x128xf32>
    %32 = arith.addf %22, %31 : vector<8x128xf32>
    %33 = vector.extract_strided_slice %0 {offsets = [3, 0], sizes = [1, 128], strides = [1, 1]} : vector<8x128xf32> to vector<1x128xf32>
    %34 = vector.broadcast %33 : vector<1x128xf32> to vector<8x128xf32>
    %35 = arith.addf %32, %34 : vector<8x128xf32>
    %36 = math.tanh %35 : vector<8x128xf32>
    %c1152 = arith.constant 1152 : index
    %c0_18 = arith.constant 0 : index
    %37 = vector.load %arg1[%c1152, %c0_18] : memref<1352x128xf32, #tpu.memory_space<vmem>>, vector<128x128xf32>
    %cst_19 = arith.constant dense<0.000000e+00> : vector<8x128xf32>
    %38 = tpu.matmul %36, %37, %cst_19 {dimension_numbers = #tpu.dot_dimension_numbers<[1], [0], [0], [1], [0, 0, 1, 1], [], []>} : vector<8x128xf32>, vector<128x128xf32>, vector<8x128xf32> -> vector<8x128xf32>
    %39 = vector.extract_strided_slice %0 {offsets = [4, 0], sizes = [1, 128], strides = [1, 1]} : vector<8x128xf32> to vector<1x128xf32>
    %40 = vector.broadcast %39 : vector<1x128xf32> to vector<8x128xf32>
    %41 = arith.addf %38, %40 : vector<8x128xf32>
    %c1280 = arith.constant 1280 : index
    %c0_20 = arith.constant 0 : index
    %42 = vector.load %arg1[%c1280, %c0_20] : memref<1352x128xf32, #tpu.memory_space<vmem>>, vector<32x128xf32>
    %43 = tpu.iota {dimensions = array<i32: 1>} : vector<1x128xi32>
    %c64_i32 = arith.constant 64 : i32
    %44 = vector.broadcast %c64_i32 : i32 to vector<1x128xi32>
    %45 = arith.cmpi sge, %43, %44 : vector<1x128xi32>
    %c96_i32 = arith.constant 96 : i32
    %46 = vector.broadcast %c96_i32 : i32 to vector<1x128xi32>
    %47 = arith.cmpi slt, %43, %46 : vector<1x128xi32>
    %48 = arith.andi %45, %47 : vector<1x128xi1>
    %cst_21 = arith.constant 1.000000e+00 : f32
    %cst_22 = arith.constant 5.000000e-01 : f32
    %49 = vector.broadcast %cst_21 : f32 to vector<1x128xf32>
    %50 = vector.broadcast %cst_22 : f32 to vector<1x128xf32>
    %51 = arith.select %48, %49, %50 : vector<1x128xi1>, vector<1x128xf32>
    %cst_23 = arith.constant 0.000000e+00 : f32
    %cst_24 = arith.constant 5.000000e-01 : f32
    %52 = vector.broadcast %cst_23 : f32 to vector<1x128xf32>
    %53 = vector.broadcast %cst_24 : f32 to vector<1x128xf32>
    %54 = arith.select %48, %52, %53 : vector<1x128xi1>, vector<1x128xf32>
    %cst_25 = arith.constant 0.000000e+00 : f32
    %55 = vector.broadcast %cst_25 : f32 to vector<1x32xf32>
    %cst_26 = arith.constant 0.000000e+00 : f32
    %56 = vector.broadcast %cst_26 : f32 to vector<1x32xf32>
    %57 = vector.extract_strided_slice %41 {offsets = [0, 0], sizes = [1, 128], strides = [1, 1]} : vector<8x128xf32> to vector<1x128xf32>
    %cst_27 = arith.constant dense<0.000000e+00> : vector<1x128xf32>
    %58 = tpu.matmul %55, %42, %cst_27 {dimension_numbers = #tpu.dot_dimension_numbers<[1], [0], [0], [1], [0, 0, 1, 1], [], []>} : vector<1x32xf32>, vector<32x128xf32>, vector<1x128xf32> -> vector<1x128xf32>
    %59 = arith.addf %57, %58 : vector<1x128xf32>
    %60 = math.tanh %59 : vector<1x128xf32>
    %61 = arith.mulf %60, %51 : vector<1x128xf32>
    %62 = arith.addf %61, %54 : vector<1x128xf32>
    %63 = vector.extract_strided_slice %62 {offsets = [0, 0], sizes = [1, 32], strides = [1, 1]} : vector<1x128xf32> to vector<1x32xf32>
    %64 = vector.extract_strided_slice %62 {offsets = [0, 32], sizes = [1, 32], strides = [1, 1]} : vector<1x128xf32> to vector<1x32xf32>
    %65 = vector.extract_strided_slice %62 {offsets = [0, 64], sizes = [1, 32], strides = [1, 1]} : vector<1x128xf32> to vector<1x32xf32>
    %66 = vector.extract_strided_slice %62 {offsets = [0, 96], sizes = [1, 32], strides = [1, 1]} : vector<1x128xf32> to vector<1x32xf32>
    %67 = arith.mulf %64, %56 : vector<1x32xf32>
    %68 = arith.mulf %63, %65 : vector<1x32xf32>
    %69 = arith.addf %67, %68 : vector<1x32xf32>
    %70 = math.tanh %69 : vector<1x32xf32>
    %71 = arith.mulf %66, %70 : vector<1x32xf32>
    %72 = vector.extract_strided_slice %41 {offsets = [1, 0], sizes = [1, 128], strides = [1, 1]} : vector<8x128xf32> to vector<1x128xf32>
    %cst_28 = arith.constant dense<0.000000e+00> : vector<1x128xf32>
    %73 = tpu.matmul %71, %42, %cst_28 {dimension_numbers = #tpu.dot_dimension_numbers<[1], [0], [0], [1], [0, 0, 1, 1], [], []>} : vector<1x32xf32>, vector<32x128xf32>, vector<1x128xf32> -> vector<1x128xf32>
    %74 = arith.addf %72, %73 : vector<1x128xf32>
    %75 = math.tanh %74 : vector<1x128xf32>
    %76 = arith.mulf %75, %51 : vector<1x128xf32>
    %77 = arith.addf %76, %54 : vector<1x128xf32>
    %78 = vector.extract_strided_slice %77 {offsets = [0, 0], sizes = [1, 32], strides = [1, 1]} : vector<1x128xf32> to vector<1x32xf32>
    %79 = vector.extract_strided_slice %77 {offsets = [0, 32], sizes = [1, 32], strides = [1, 1]} : vector<1x128xf32> to vector<1x32xf32>
    %80 = vector.extract_strided_slice %77 {offsets = [0, 64], sizes = [1, 32], strides = [1, 1]} : vector<1x128xf32> to vector<1x32xf32>
    %81 = vector.extract_strided_slice %77 {offsets = [0, 96], sizes = [1, 32], strides = [1, 1]} : vector<1x128xf32> to vector<1x32xf32>
    %82 = arith.mulf %79, %69 : vector<1x32xf32>
    %83 = arith.mulf %78, %80 : vector<1x32xf32>
    %84 = arith.addf %82, %83 : vector<1x32xf32>
    %85 = math.tanh %84 : vector<1x32xf32>
    %86 = arith.mulf %81, %85 : vector<1x32xf32>
    %87 = vector.extract_strided_slice %41 {offsets = [2, 0], sizes = [1, 128], strides = [1, 1]} : vector<8x128xf32> to vector<1x128xf32>
    %cst_29 = arith.constant dense<0.000000e+00> : vector<1x128xf32>
    %88 = tpu.matmul %86, %42, %cst_29 {dimension_numbers = #tpu.dot_dimension_numbers<[1], [0], [0], [1], [0, 0, 1, 1], [], []>} : vector<1x32xf32>, vector<32x128xf32>, vector<1x128xf32> -> vector<1x128xf32>
    %89 = arith.addf %87, %88 : vector<1x128xf32>
    %90 = math.tanh %89 : vector<1x128xf32>
    %91 = arith.mulf %90, %51 : vector<1x128xf32>
    %92 = arith.addf %91, %54 : vector<1x128xf32>
    %93 = vector.extract_strided_slice %92 {offsets = [0, 0], sizes = [1, 32], strides = [1, 1]} : vector<1x128xf32> to vector<1x32xf32>
    %94 = vector.extract_strided_slice %92 {offsets = [0, 32], sizes = [1, 32], strides = [1, 1]} : vector<1x128xf32> to vector<1x32xf32>
    %95 = vector.extract_strided_slice %92 {offsets = [0, 64], sizes = [1, 32], strides = [1, 1]} : vector<1x128xf32> to vector<1x32xf32>
    %96 = vector.extract_strided_slice %92 {offsets = [0, 96], sizes = [1, 32], strides = [1, 1]} : vector<1x128xf32> to vector<1x32xf32>
    %97 = arith.mulf %94, %84 : vector<1x32xf32>
    %98 = arith.mulf %93, %95 : vector<1x32xf32>
    %99 = arith.addf %97, %98 : vector<1x32xf32>
    %100 = math.tanh %99 : vector<1x32xf32>
    %101 = arith.mulf %96, %100 : vector<1x32xf32>
    %102 = vector.extract_strided_slice %41 {offsets = [3, 0], sizes = [1, 128], strides = [1, 1]} : vector<8x128xf32> to vector<1x128xf32>
    %cst_30 = arith.constant dense<0.000000e+00> : vector<1x128xf32>
    %103 = tpu.matmul %101, %42, %cst_30 {dimension_numbers = #tpu.dot_dimension_numbers<[1], [0], [0], [1], [0, 0, 1, 1], [], []>} : vector<1x32xf32>, vector<32x128xf32>, vector<1x128xf32> -> vector<1x128xf32>
    %104 = arith.addf %102, %103 : vector<1x128xf32>
    %105 = math.tanh %104 : vector<1x128xf32>
    %106 = arith.mulf %105, %51 : vector<1x128xf32>
    %107 = arith.addf %106, %54 : vector<1x128xf32>
    %108 = vector.extract_strided_slice %107 {offsets = [0, 0], sizes = [1, 32], strides = [1, 1]} : vector<1x128xf32> to vector<1x32xf32>
    %109 = vector.extract_strided_slice %107 {offsets = [0, 32], sizes = [1, 32], strides = [1, 1]} : vector<1x128xf32> to vector<1x32xf32>
    %110 = vector.extract_strided_slice %107 {offsets = [0, 64], sizes = [1, 32], strides = [1, 1]} : vector<1x128xf32> to vector<1x32xf32>
    %111 = vector.extract_strided_slice %107 {offsets = [0, 96], sizes = [1, 32], strides = [1, 1]} : vector<1x128xf32> to vector<1x32xf32>
    %112 = arith.mulf %109, %99 : vector<1x32xf32>
    %113 = arith.mulf %108, %110 : vector<1x32xf32>
    %114 = arith.addf %112, %113 : vector<1x32xf32>
    %115 = math.tanh %114 : vector<1x32xf32>
    %116 = arith.mulf %111, %115 : vector<1x32xf32>
    %117 = vector.extract_strided_slice %41 {offsets = [4, 0], sizes = [1, 128], strides = [1, 1]} : vector<8x128xf32> to vector<1x128xf32>
    %cst_31 = arith.constant dense<0.000000e+00> : vector<1x128xf32>
    %118 = tpu.matmul %116, %42, %cst_31 {dimension_numbers = #tpu.dot_dimension_numbers<[1], [0], [0], [1], [0, 0, 1, 1], [], []>} : vector<1x32xf32>, vector<32x128xf32>, vector<1x128xf32> -> vector<1x128xf32>
    %119 = arith.addf %117, %118 : vector<1x128xf32>
    %120 = math.tanh %119 : vector<1x128xf32>
    %121 = arith.mulf %120, %51 : vector<1x128xf32>
    %122 = arith.addf %121, %54 : vector<1x128xf32>
    %123 = vector.extract_strided_slice %122 {offsets = [0, 0], sizes = [1, 32], strides = [1, 1]} : vector<1x128xf32> to vector<1x32xf32>
    %124 = vector.extract_strided_slice %122 {offsets = [0, 32], sizes = [1, 32], strides = [1, 1]} : vector<1x128xf32> to vector<1x32xf32>
    %125 = vector.extract_strided_slice %122 {offsets = [0, 64], sizes = [1, 32], strides = [1, 1]} : vector<1x128xf32> to vector<1x32xf32>
    %126 = vector.extract_strided_slice %122 {offsets = [0, 96], sizes = [1, 32], strides = [1, 1]} : vector<1x128xf32> to vector<1x32xf32>
    %127 = arith.mulf %124, %114 : vector<1x32xf32>
    %128 = arith.mulf %123, %125 : vector<1x32xf32>
    %129 = arith.addf %127, %128 : vector<1x32xf32>
    %130 = math.tanh %129 : vector<1x32xf32>
    %131 = arith.mulf %126, %130 : vector<1x32xf32>
    %132 = vector.extract_strided_slice %41 {offsets = [5, 0], sizes = [1, 128], strides = [1, 1]} : vector<8x128xf32> to vector<1x128xf32>
    %cst_32 = arith.constant dense<0.000000e+00> : vector<1x128xf32>
    %133 = tpu.matmul %131, %42, %cst_32 {dimension_numbers = #tpu.dot_dimension_numbers<[1], [0], [0], [1], [0, 0, 1, 1], [], []>} : vector<1x32xf32>, vector<32x128xf32>, vector<1x128xf32> -> vector<1x128xf32>
    %134 = arith.addf %132, %133 : vector<1x128xf32>
    %135 = math.tanh %134 : vector<1x128xf32>
    %136 = arith.mulf %135, %51 : vector<1x128xf32>
    %137 = arith.addf %136, %54 : vector<1x128xf32>
    %138 = vector.extract_strided_slice %137 {offsets = [0, 0], sizes = [1, 32], strides = [1, 1]} : vector<1x128xf32> to vector<1x32xf32>
    %139 = vector.extract_strided_slice %137 {offsets = [0, 32], sizes = [1, 32], strides = [1, 1]} : vector<1x128xf32> to vector<1x32xf32>
    %140 = vector.extract_strided_slice %137 {offsets = [0, 64], sizes = [1, 32], strides = [1, 1]} : vector<1x128xf32> to vector<1x32xf32>
    %141 = vector.extract_strided_slice %137 {offsets = [0, 96], sizes = [1, 32], strides = [1, 1]} : vector<1x128xf32> to vector<1x32xf32>
    %142 = arith.mulf %139, %129 : vector<1x32xf32>
    %143 = arith.mulf %138, %140 : vector<1x32xf32>
    %144 = arith.addf %142, %143 : vector<1x32xf32>
    %145 = math.tanh %144 : vector<1x32xf32>
    %146 = arith.mulf %141, %145 : vector<1x32xf32>
    %147 = vector.extract_strided_slice %41 {offsets = [6, 0], sizes = [1, 128], strides = [1, 1]} : vector<8x128xf32> to vector<1x128xf32>
    %cst_33 = arith.constant dense<0.000000e+00> : vector<1x128xf32>
    %148 = tpu.matmul %146, %42, %cst_33 {dimension_numbers = #tpu.dot_dimension_numbers<[1], [0], [0], [1], [0, 0, 1, 1], [], []>} : vector<1x32xf32>, vector<32x128xf32>, vector<1x128xf32> -> vector<1x128xf32>
    %149 = arith.addf %147, %148 : vector<1x128xf32>
    %150 = math.tanh %149 : vector<1x128xf32>
    %151 = arith.mulf %150, %51 : vector<1x128xf32>
    %152 = arith.addf %151, %54 : vector<1x128xf32>
    %153 = vector.extract_strided_slice %152 {offsets = [0, 0], sizes = [1, 32], strides = [1, 1]} : vector<1x128xf32> to vector<1x32xf32>
    %154 = vector.extract_strided_slice %152 {offsets = [0, 32], sizes = [1, 32], strides = [1, 1]} : vector<1x128xf32> to vector<1x32xf32>
    %155 = vector.extract_strided_slice %152 {offsets = [0, 64], sizes = [1, 32], strides = [1, 1]} : vector<1x128xf32> to vector<1x32xf32>
    %156 = vector.extract_strided_slice %152 {offsets = [0, 96], sizes = [1, 32], strides = [1, 1]} : vector<1x128xf32> to vector<1x32xf32>
    %157 = arith.mulf %154, %144 : vector<1x32xf32>
    %158 = arith.mulf %153, %155 : vector<1x32xf32>
    %159 = arith.addf %157, %158 : vector<1x32xf32>
    %160 = math.tanh %159 : vector<1x32xf32>
    %161 = arith.mulf %156, %160 : vector<1x32xf32>
    %162 = vector.extract_strided_slice %41 {offsets = [7, 0], sizes = [1, 128], strides = [1, 1]} : vector<8x128xf32> to vector<1x128xf32>
    %cst_34 = arith.constant dense<0.000000e+00> : vector<1x128xf32>
    %163 = tpu.matmul %161, %42, %cst_34 {dimension_numbers = #tpu.dot_dimension_numbers<[1], [0], [0], [1], [0, 0, 1, 1], [], []>} : vector<1x32xf32>, vector<32x128xf32>, vector<1x128xf32> -> vector<1x128xf32>
    %164 = arith.addf %162, %163 : vector<1x128xf32>
    %165 = math.tanh %164 : vector<1x128xf32>
    %166 = arith.mulf %165, %51 : vector<1x128xf32>
    %167 = arith.addf %166, %54 : vector<1x128xf32>
    %168 = vector.extract_strided_slice %167 {offsets = [0, 0], sizes = [1, 32], strides = [1, 1]} : vector<1x128xf32> to vector<1x32xf32>
    %169 = vector.extract_strided_slice %167 {offsets = [0, 32], sizes = [1, 32], strides = [1, 1]} : vector<1x128xf32> to vector<1x32xf32>
    %170 = vector.extract_strided_slice %167 {offsets = [0, 64], sizes = [1, 32], strides = [1, 1]} : vector<1x128xf32> to vector<1x32xf32>
    %171 = vector.extract_strided_slice %167 {offsets = [0, 96], sizes = [1, 32], strides = [1, 1]} : vector<1x128xf32> to vector<1x32xf32>
    %172 = arith.mulf %169, %159 : vector<1x32xf32>
    %173 = arith.mulf %168, %170 : vector<1x32xf32>
    %174 = arith.addf %172, %173 : vector<1x32xf32>
    %175 = math.tanh %174 : vector<1x32xf32>
    %176 = arith.mulf %171, %175 : vector<1x32xf32>
    %c1312 = arith.constant 1312 : index
    %c0_35 = arith.constant 0 : index
    %177 = vector.load %arg1[%c1312, %c0_35] : memref<1352x128xf32, #tpu.memory_space<vmem>>, vector<32x128xf32>
    %cst_36 = arith.constant dense<0.000000e+00> : vector<1x128xf32>
    %178 = tpu.matmul %176, %177, %cst_36 {dimension_numbers = #tpu.dot_dimension_numbers<[1], [0], [0], [1], [0, 0, 1, 1], [], []>} : vector<1x32xf32>, vector<32x128xf32>, vector<1x128xf32> -> vector<1x128xf32>
    %179 = vector.extract_strided_slice %0 {offsets = [5, 0], sizes = [1, 128], strides = [1, 1]} : vector<8x128xf32> to vector<1x128xf32>
    %180 = arith.addf %178, %179 : vector<1x128xf32>
    %181 = math.tanh %180 : vector<1x128xf32>
    %c0_37 = arith.constant 0 : index
    %c0_38 = arith.constant 0 : index
    %182 = vector.load %arg2[%c0_37, %c0_38] : memref<1x128xf32, #tpu.memory_space<vmem>>, vector<1x128xf32>
    tpu.vector_store %arg2[%c0_37, %c0_38], %181 {strides = array<i32>} : memref<1x128xf32, #tpu.memory_space<vmem>>, vector<1x128xf32>,
    return
  }
}

</mosaic_0001>

<bundles_post_ra>
// kernel: forward.1
= control target key start
LH: loop header
LB: loop body
LE: loop exit
PB: predicated region body
PF: predicated region fallthrough
CT: control target
= control target key end

     0   :  { %7 = vsyncpa [#allocation3], 0  ;;  %s2685_s0 = inlined_call_operand.vmem [shape: f32[8,256], index: 0, kind: input, shape index: {}]   ;;  %s2686_s1 = inlined_call_operand.hbm [shape: f32[1352,128], index: 1, kind: input, shape index: {}]   ;;  %s2687_s2 = inlined_call_operand.hbm [shape: f32[1,128], index: 2, kind: output, shape index: {}]  }
   0x1   :  { %8 = vsyncpa [#allocation4], 0  ;;  %s2436_s9 = smov [#allocation2]   ;;  %s2388_s13 = scalar_lea.hbm %s2686_s1, 21632 }
   0x2   :  { %s16_s10 = sshll.u32 %s2436_s9, 4  ;;  %p2389_p0 = scmp.ne.s32.totalorder %s2686_s1, %s2388_s13  ;;  %s17_s10 = int_to_ptr.vmem [resolvable:$true] %s16_s10 }
   0x3   :  { %p2392_p1 = scmp.lt.u32.totalorder %s2388_s13, %s2686_s1 }
   0x5   :  { %p2394_p2 = pnand %p2392_p1, %p2389_p0 }
   0x7   :  { %2397 = shalt.err (!%p2394_p2)
}
   0x8   :  { %s2398_s18 = scalar_lea.vmem %s17_s10, 21632  ;;  %p2403_p4 = scmp.lt.s32.totalorder %s17_s10, %s17_s10 }
   0x9   :  { %p2399_p3 = scmp.ne.s32.totalorder %s17_s10, %s2398_s18  ;;  %p2404_p5 = scmp.lt.s32.totalorder %s2398_s18, %s2398_s18 }
   0xb   :  { %p2405_p6 = por %p2404_p5, %p2403_p4 }
   0xd   :  { %p2406_p7 = pnand %p2405_p6, %p2399_p3 }
   0xf   :  { %2409 = shalt.err (!%p2406_p7)
}
  0x10   :  { %s2437_s19 = smov 128   ;;  %s2438_s20 = smov 8  }
  0x11   :  { %22 = dma.hbm_to_vmem [thread:$0]  %s2686_s1, 21632, %s17_s10, [#allocation3], %s2437_s19, %s2437_s19, %s2438_s20  }
  0x12   :  { %2432 = dma.done.wait [#allocation3], 21632  }
  0x13   :  { %2433 = vsyncadd [#allocation3], 4294945664  ;;  %v45_v0 = vld [vmem:[#allocation2 + $0x80] sm:$0xff]  ;;  %v46_v1 = vld [vmem:[#allocation2 + $0x88] sm:$0xff]  ;;  %vm2440_vm0 = vmmov 0   ;;  %s2444_s26 = smov 32  }
  0x14   :  { %v168_v2 = vld [vmem:[#allocation2 + $0x180] sm:$0xff]  ;;  %v2096_v3 = vpack.c.bf16 %v46_v1, %v45_v0  ;;  %v169_v4 = vld [vmem:[#allocation2 + $0x188] sm:$0xff]  ;;  %v47_v11 = vld [vmem:[#allocation2 + $0x90] sm:$0xff]  ;;  %vm716_vm4 = vcmask 261120   ;;  %s2445_s27 = smov [#allocation5]  }
  0x15   :  { %v29_v5 = vld [vmem:[#allocation2] sm:$0xff]  ;;  %v30_v6 = vld [vmem:[#allocation2 + $0x8] sm:$0xff]  ;;  %v2128_v7 = vpack.c.bf16 %v169_v4, %v168_v2  ;;  %v48_v13 = vld [vmem:[#allocation2 + $0x98] sm:$0xff]  ;;  %s1622_s28 = sshll.u32 %s2445_s27, 4  ;;  %s1623_s28 = int_to_ptr.vmem [resolvable:$true] %s1622_s28 }
  0x16   :  { %v2098_v8 = vpack.c.bf16 %v30_v6, %v29_v5  ;;  %v152_v9 = vld [vmem:[#allocation2 + $0x100] sm:$0xff]  ;;  %v153_v10 = vld [vmem:[#allocation2 + $0x108] sm:$0xff]  ;;  %2097 = vmatprep.subr.bf16.mxu0 %v2096_v3  ;;  %v170_v14 = vld [vmem:[#allocation2 + $0x190] sm:$0xff]  ;;  %v2100_v16 = vpack.c.bf16 %v48_v13, %v47_v11  ;;  %s2410_s29 = scalar_lea.vmem %s1623_s28, 16  ;;  %s2414_s30 = scalar_lea.vmem %s1623_s28, 32 }
  0x17   :  { %v2130_v12 = vpack.c.bf16 %v153_v10, %v152_v9  ;;  %v171_v15 = vld [vmem:[#allocation2 + $0x198] sm:$0xff]  ;;  %2129 = vmatprep.subr.bf16.mxu1 %v2128_v7  ;;  %v31_v18 = vld [vmem:[#allocation2 + $0x10] sm:$0xff]  ;;  %v49_v23 = vld [vmem:[#allocation2 + $0xa0] sm:$0xff]  ;;  %p2411_p8 = scmp.ne.s32.totalorder %s1623_s28, %s2410_s29  ;;  %p2415_p9 = scmp.lt.s32.totalorder %s1623_s28, %s1623_s28 }
  0x18   :  { %2099 = vmatpush3.bf16.msra.mxu0 %v2098_v8  ;;  %v2132_v17 = vpack.c.bf16 %v171_v15, %v170_v14  ;;  %v32_v19 = vld [vmem:[#allocation2 + $0x18] sm:$0xff]  ;;  %v154_v20 = vld [vmem:[#allocation2 + $0x110] sm:$0xff]  ;;  %v50_v24 = vld [vmem:[#allocation2 + $0xa8] sm:$0xff]  ;;  %p2416_p10 = scmp.lt.s32.totalorder %s2414_s30, %s2410_s29 }
  0x19   :  { %2131 = vmatpush3.bf16.msra.mxu1 %v2130_v12  ;;  %v2102_v21 = vpack.c.bf16 %v32_v19, %v31_v18  ;;  %v155_v22 = vld [vmem:[#allocation2 + $0x118] sm:$0xff]  ;;  %2101 = vmatprep.subr.bf16.mxu0 %v2100_v16  ;;  %v2104_v26 = vpack.c.bf16 %v50_v24, %v49_v23  ;;  %v172_v27 = vld [vmem:[#allocation2 + $0x1a0] sm:$0xff]  ;;  %v173_v28 = vld [vmem:[#allocation2 + $0x1a8] sm:$0xff] }
  0x1a   :  { %2133 = vmatprep.subr.bf16.mxu1 %v2132_v17  ;;  %v2134_v25 = vpack.c.bf16 %v155_v22, %v154_v20  ;;  %v33_v29 = vld [vmem:[#allocation2 + $0x20] sm:$0xff]  ;;  %v2136_v30 = vpack.c.bf16 %v173_v28, %v172_v27  ;;  %v34_v31 = vld [vmem:[#allocation2 + $0x28] sm:$0xff]  ;;  %v51_v35 = vld [vmem:[#allocation2 + $0xb0] sm:$0xff]  ;;  %p2417_p11 = por %p2416_p10, %p2415_p9 }
  0x1b   :  { %v156_v32 = vld [vmem:[#allocation2 + $0x120] sm:$0xff]  ;;  %v157_v33 = vld [vmem:[#allocation2 + $0x128] sm:$0xff]  ;;  %v2106_v34 = vpack.c.bf16 %v34_v31, %v33_v29  ;;  %v52_v36 = vld [vmem:[#allocation2 + $0xb8] sm:$0xff] }
  0x1c   :  { %2103 = vmatpush3.bf16.msra.mxu0 %v2102_v21  ;;  %v174_v37 = vld [vmem:[#allocation2 + $0x1b0] sm:$0xff]  ;;  %v2138_v38 = vpack.c.bf16 %v157_v33, %v156_v32  ;;  %v2108_v39 = vpack.c.bf16 %v52_v36, %v51_v35  ;;  %v175_v40 = vld [vmem:[#allocation2 + $0x1b8] sm:$0xff]  ;;  %v53_v46 = vld [vmem:[#allocation2 + $0xc0] sm:$0xff]  ;;  %p2418_p12 = pnand %p2417_p11, %p2411_p8 }
  0x1d   :  { %2135 = vmatpush3.bf16.msra.mxu1 %v2134_v25  ;;  %2105 = vmatprep.subr.bf16.mxu0 %v2104_v26  ;;  %v35_v41 = vld [vmem:[#allocation2 + $0x30] sm:$0xff]  ;;  %v36_v42 = vld [vmem:[#allocation2 + $0x38] sm:$0xff]  ;;  %v2140_v43 = vpack.c.bf16 %v175_v40, %v174_v37  ;;  %v54_v47 = vld [vmem:[#allocation2 + $0xc8] sm:$0xff] }
  0x1e   :  { %2137 = vmatprep.subr.bf16.mxu1 %v2136_v30  ;;  %v158_v44 = vld [vmem:[#allocation2 + $0x130] sm:$0xff]  ;;  %v159_v45 = vld [vmem:[#allocation2 + $0x138] sm:$0xff]  ;;  %v176_v48 = vld [vmem:[#allocation2 + $0x1c0] sm:$0xff]  ;;  %v2110_v50 = vpack.c.bf16 %v36_v42, %v35_v41  ;;  %v2112_v52 = vpack.c.bf16 %v54_v47, %v53_v46 }
  0x1f   :  { %v177_v49 = vld [vmem:[#allocation2 + $0x1c8] sm:$0xff]  ;;  %v2142_v51 = vpack.c.bf16 %v159_v45, %v158_v44  ;;  %v37_v53 = vld [vmem:[#allocation2 + $0x40] sm:$0xff]  ;;  %v55_v58 = vld [vmem:[#allocation2 + $0xd0] sm:$0xff] }
  0x20   :  { %2107 = vmatpush3.bf16.msra.mxu0 %v2106_v34  ;;  %v38_v54 = vld [vmem:[#allocation2 + $0x48] sm:$0xff]  ;;  %v160_v55 = vld [vmem:[#allocation2 + $0x140] sm:$0xff]  ;;  %v2144_v56 = vpack.c.bf16 %v177_v49, %v176_v48  ;;  %v56_v59 = vld [vmem:[#allocation2 + $0xd8] sm:$0xff] }
  0x21   :  { %2139 = vmatpush3.bf16.msra.mxu1 %v2138_v38  ;;  %2109 = vmatprep.subr.bf16.mxu0 %v2108_v39  ;;  %v161_v57 = vld [vmem:[#allocation2 + $0x148] sm:$0xff]  ;;  %v178_v60 = vld [vmem:[#allocation2 + $0x1d0] sm:$0xff]  ;;  %v179_v61 = vld [vmem:[#allocation2 + $0x1d8] sm:$0xff]  ;;  %v2114_v62 = vpack.c.bf16 %v38_v54, %v37_v53  ;;  %v2116_v0 = vpack.c.bf16 %v56_v59, %v55_v58  ;;  %v2439_v39 = vmov 0.0|0.0  }
  0x22   :  { %2141 = vmatprep.subr.bf16.mxu1 %v2140_v43  ;;  %v2146_v63 = vpack.c.bf16 %v161_v57, %v160_v55  ;;  %v39_v1 = vld [vmem:[#allocation2 + $0x50] sm:$0xff]  ;;  %v40_v2 = vld [vmem:[#allocation2 + $0x58] sm:$0xff]  ;;  %v2148_v4 = vpack.c.bf16 %v179_v61, %v178_v60  ;;  %v57_v6 = vld [vmem:[#allocation2 + $0xe0] sm:$0xff] }
  0x23   :  { %v162_v3 = vld [vmem:[#allocation2 + $0x150] sm:$0xff]  ;;  %v163_v5 = vld [vmem:[#allocation2 + $0x158] sm:$0xff]  ;;  %v58_v7 = vld [vmem:[#allocation2 + $0xe8] sm:$0xff]  ;;  %v2118_v10 = vpack.c.bf16 %v40_v2, %v39_v1 }
  0x24   :  { %2111 = vmatpush3.bf16.msra.mxu0 %v2110_v50  ;;  %v180_v8 = vld [vmem:[#allocation2 + $0x1e0] sm:$0xff]  ;;  %v181_v9 = vld [vmem:[#allocation2 + $0x1e8] sm:$0xff]  ;;  %v2150_v12 = vpack.c.bf16 %v163_v5, %v162_v3  ;;  %v2120_v13 = vpack.c.bf16 %v58_v7, %v57_v6  ;;  %v59_v19 = vld [vmem:[#allocation2 + $0xf0] sm:$0xff] }
  0x25   :  { %2143 = vmatpush3.bf16.msra.mxu1 %v2142_v51  ;;  %2113 = vmatprep.subr.bf16.mxu0 %v2112_v52  ;;  %v41_v11 = vld [vmem:[#allocation2 + $0x60] sm:$0xff]  ;;  %v42_v14 = vld [vmem:[#allocation2 + $0x68] sm:$0xff]  ;;  %v2152_v17 = vpack.c.bf16 %v181_v9, %v180_v8  ;;  %v60_v20 = vld [vmem:[#allocation2 + $0xf8] sm:$0xff] }
  0x26   :  { %2145 = vmatprep.subr.bf16.mxu1 %v2144_v56  ;;  %v164_v15 = vld [vmem:[#allocation2 + $0x160] sm:$0xff]  ;;  %v2476_v16 = vld [vmem:[%s2685_s0 + $0x8] sm:$0xff]  ;;  %v182_v21 = vld [vmem:[#allocation2 + $0x1f0] sm:$0xff]  ;;  %v2122_v23 = vpack.c.bf16 %v42_v14, %v41_v11  ;;  %v2124_v25 = vpack.c.bf16 %v60_v20, %v59_v19 }
  0x27   :  { %v165_v18 = vld [vmem:[#allocation2 + $0x168] sm:$0xff]  ;;  %129 = vmatprep.mubr.f32.mxu0 %v2476_v16  ;;  %v183_v22 = vld [vmem:[#allocation2 + $0x1f8] sm:$0xff]  ;;  %252 = vmatprep.mubr.f32.mxu1 %v2476_v16  ;;  %v43_v26 = vld [vmem:[#allocation2 + $0x70] sm:$0xff] }
  0x28   :  { %2115 = vmatpush3.bf16.msra.mxu0 %v2114_v62  ;;  %v2154_v24 = vpack.c.bf16 %v165_v18, %v164_v15  ;;  %v44_v27 = vld [vmem:[#allocation2 + $0x78] sm:$0xff]  ;;  %v2156_v28 = vpack.c.bf16 %v183_v22, %v182_v21  ;;  %v166_v29 = vld [vmem:[#allocation2 + $0x170] sm:$0xff]  ;;  %v259_v33 = vld [vmem:[#allocation2 + $0x380] sm:$0xff] }
  0x29   :  { %2147 = vmatpush3.bf16.msra.mxu1 %v2146_v63  ;;  %2117 = vmatprep.subr.bf16.mxu0 %v2116_v0  ;;  %v167_v30 = vld [vmem:[#allocation2 + $0x178] sm:$0xff]  ;;  %v2126_v31 = vpack.c.bf16 %v44_v27, %v43_v26  ;;  %v260_v34 = vld [vmem:[#allocation2 + $0x388] sm:$0xff]  ;;  %v136_v35 = vld [vmem:[#allocation2 + $0x300] sm:$0xff] }
  0x2a   :  { %2149 = vmatprep.subr.bf16.mxu1 %v2148_v4  ;;  %v2158_v32 = vpack.c.bf16 %v167_v30, %v166_v29  ;;  %v137_v36 = vld [vmem:[#allocation2 + $0x308] sm:$0xff]  ;;  %v2483_v37 = vld [vmem:[%s2685_s0] sm:$0xff]  ;;  %v2161_v38 = vpack.c.bf16 %v260_v34, %v259_v33  ;;  %v261_v41 = vld [vmem:[#allocation2 + $0x390] sm:$0xff]  ;;  %s2443_s0 = smov 64  }
  0x2b   :  { %v2185_v40 = vpack.c.bf16 %v137_v36, %v136_v35  ;;  %v262_v42 = vld [vmem:[#allocation2 + $0x398] sm:$0xff]  ;;  %v138_v43 = vld [vmem:[#allocation2 + $0x310] sm:$0xff]  ;;  %v263_v47 = vld [vmem:[#allocation2 + $0x3a0] sm:$0xff] }
  0x2c   :  { %2119 = vmatpush3.bf16.msra.mxu0 %v2118_v10  ;;  %v139_v44 = vld [vmem:[#allocation2 + $0x318] sm:$0xff]  ;;  %v2164_v45 = vpack.c.bf16 %v262_v42, %v261_v41  ;;  %v264_v48 = vld [vmem:[#allocation2 + $0x3a8] sm:$0xff]  ;;  %v140_v49 = vld [vmem:[#allocation2 + $0x320] sm:$0xff] }
  0x2d   :  { %2151 = vmatpush3.bf16.msra.mxu1 %v2150_v12  ;;  %2121 = vmatprep.subr.bf16.mxu0 %v2120_v13  ;;  %v2188_v46 = vpack.c.bf16 %v139_v44, %v138_v43  ;;  %v141_v50 = vld [vmem:[#allocation2 + $0x328] sm:$0xff]  ;;  %v2167_v51 = vpack.c.bf16 %v264_v48, %v263_v47  ;;  %v265_v53 = vld [vmem:[#allocation2 + $0x3b0] sm:$0xff]  ;;  %v266_v54 = vld [vmem:[#allocation2 + $0x3b8] sm:$0xff] }
  0x2e   :  { %2153 = vmatprep.subr.bf16.mxu1 %v2152_v17  ;;  %v2191_v52 = vpack.c.bf16 %v141_v50, %v140_v49  ;;  %v142_v55 = vld [vmem:[#allocation2 + $0x330] sm:$0xff]  ;;  %v143_v56 = vld [vmem:[#allocation2 + $0x338] sm:$0xff]  ;;  %v2170_v57 = vpack.c.bf16 %v266_v54, %v265_v53  ;;  %v267_v59 = vld [vmem:[#allocation2 + $0x3c0] sm:$0xff] }
  0x2f   :  { %v2194_v58 = vpack.c.bf16 %v143_v56, %v142_v55  ;;  %v268_v60 = vld [vmem:[#allocation2 + $0x3c8] sm:$0xff]  ;;  %v144_v61 = vld [vmem:[#allocation2 + $0x340] sm:$0xff]  ;;  %v269_v1 = vld [vmem:[#allocation2 + $0x3d0] sm:$0xff] }
  0x30   :  { %2123 = vmatpush3.bf16.msra.mxu0 %v2122_v23  ;;  %v145_v62 = vld [vmem:[#allocation2 + $0x348] sm:$0xff]  ;;  %v2173_v63 = vpack.c.bf16 %v268_v60, %v267_v59  ;;  %v270_v2 = vld [vmem:[#allocation2 + $0x3d8] sm:$0xff]  ;;  %v146_v3 = vld [vmem:[#allocation2 + $0x350] sm:$0xff]  ;;  %v2441_v23 = vmov 0.0  }
  0x31   :  { %2155 = vmatpush3.bf16.msra.mxu1 %v2154_v24  ;;  %2125 = vmatprep.subr.bf16.mxu0 %v2124_v25  ;;  %v2197_v0 = vpack.c.bf16 %v145_v62, %v144_v61  ;;  %v147_v4 = vld [vmem:[#allocation2 + $0x358] sm:$0xff]  ;;  %v2176_v5 = vpack.c.bf16 %v270_v2, %v269_v1  ;;  %v271_v7 = vld [vmem:[#allocation2 + $0x3e0] sm:$0xff]  ;;  %v272_v8 = vld [vmem:[#allocation2 + $0x3e8] sm:$0xff]  ;;  %v61_v24 = vlaneseq }
  0x32   :  { %2157 = vmatprep.subr.bf16.mxu1 %v2156_v28  ;;  %v2200_v6 = vpack.c.bf16 %v147_v4, %v146_v3  ;;  %v2179_v9 = vpack.c.bf16 %v272_v8, %v271_v7  ;;  %v148_v10 = vld [vmem:[#allocation2 + $0x360] sm:$0xff]  ;;  %v149_v11 = vld [vmem:[#allocation2 + $0x368] sm:$0xff]  ;;  %v273_v13 = vld [vmem:[#allocation2 + $0x3f0] sm:$0xff] }
  0x33   :  { %v2203_v12 = vpack.c.bf16 %v149_v11, %v148_v10  ;;  %v274_v14 = vld [vmem:[#allocation2 + $0x3f8] sm:$0xff]  ;;  %v150_v17 = vld [vmem:[#allocation2 + $0x370] sm:$0xff]  ;;  %v431_v20 = vld [vmem:[#allocation2 + $0x280] sm:$0xff]  ;;  %v2509_v25 = vshrl.u32 %v61_v24, 7 }
  0x34   :  { %2127 = vmatpush3.bf16.msra.mxu0 %v2126_v31  ;;  %v2182_v15 = vpack.c.bf16 %v274_v14, %v273_v13  ;;  %v151_v18 = vld [vmem:[#allocation2 + $0x378] sm:$0xff]  ;;  %v432_v21 = vld [vmem:[#allocation2 + $0x288] sm:$0xff]  ;;  %v2512_v27 = vld [vmem:[#allocation2 + $0x540] sm:$0xff] }
  0x35   :  { %2159 = vmatpush3.bf16.msra.mxu1 %v2158_v32  ;;  %2160 = vmatprep.subr.bf16.mxu0 %v2439_v39  ;;  %v2206_v19 = vpack.c.bf16 %v151_v18, %v150_v17  ;;  %v2208_v22 = vpack.c.bf16 %v432_v21, %v431_v20  ;;  %v63_v26 = vsub.s32 0, %v2509_v25  ;;  %v186_v28 = vsub.s32 1, %v2509_v25  ;;  %v433_v42 = vld [vmem:[#allocation2 + $0x290] sm:$0xff]  ;;  %v434_v43 = vld [vmem:[#allocation2 + $0x298] sm:$0xff]  ;;  %v419_v55 = vld [vmem:[#allocation2 + $0x220] sm:$0xff] }
  0x36   :  { %2184 = vmatprep.subr.bf16.mxu1 %v2439_v39  ;;  %v2212_v48 = vpack.c.bf16 %v434_v43, %v433_v42  ;;  %v417_v49 = vld [vmem:[#allocation2 + $0x210] sm:$0xff]  ;;  %v418_v50 = vld [vmem:[#allocation2 + $0x218] sm:$0xff]  ;;  %v420_v56 = vld [vmem:[#allocation2 + $0x228] sm:$0xff] }
  0x37   :  { %130 = vmatmul.mubr.f32.vlgmr.msra.gmra.mrb[0].mxu0 %v2483_v37  ;;  %v64_v30 = vrot.slane %v2512_v27, %v63_v26  ;;  %v187_v33 = vrot.slane %v2512_v27, %v186_v28  ;;  %v2214_v53 = vpack.c.bf16 %v418_v50, %v417_v49  ;;  %v2218_v59 = vpack.c.bf16 %v420_v56, %v419_v55  ;;  %v421_v61 = vld [vmem:[#allocation2 + $0x230] sm:$0xff]  ;;  %v422_v62 = vld [vmem:[#allocation2 + $0x238] sm:$0xff]  ;;  %v423_v3 = vld [vmem:[#allocation2 + $0x240] sm:$0xff] }
  0x38   :  { %253 = vmatmul.mubr.f32.vlgmr.msra.gmra.mrb[0].mxu1 %v2483_v37  ;;  %2162 = vmatpush3.bf16.msra.mxu0 %v2161_v38  ;;  %v415_v38 = vld [vmem:[#allocation2 + $0x200] sm:$0xff]  ;;  %v2222_v1 = vpack.c.bf16 %v422_v62, %v421_v61  ;;  %v441_v4 = vld [vmem:[#allocation2 + $0x2d0] sm:$0xff]  ;;  %v444_v11 = vld [vmem:[#allocation2 + $0x2e8] sm:$0xff] }
  0x39   :  { %2186 = vmatpush3.bf16.msra.mxu1 %v2185_v40  ;;  %2163 = vmatprep.subr.bf16.mxu0 %v2439_v39  ;;  %v416_v40 = vld [vmem:[#allocation2 + $0x208] sm:$0xff]  ;;  %v425_v8 = vld [vmem:[#allocation2 + $0x250] sm:$0xff]  ;;  %v443_v10 = vld [vmem:[#allocation2 + $0x2e0] sm:$0xff] }
  0x3a   :  { %2187 = vmatprep.subr.bf16.mxu1 %v2439_v39  ;;  %1889 = vmatprep.mubr.msk.f32.mxu0 %vm2440_vm0, %v2441_v23  ;;  %v2232_v13 = vpack.c.bf16 %v444_v11, %v443_v10  ;;  %v427_v14 = vld [vmem:[#allocation2 + $0x260] sm:$0xff]  ;;  %v445_v17 = vld [vmem:[#allocation2 + $0x2f0] sm:$0xff]  ;;  %v446_v18 = vld [vmem:[#allocation2 + $0x2f8] sm:$0xff] }
  0x3b   :  { %1924 = vmatprep.mubr.msk.f32.mxu1 %vm2440_vm0, %v2441_v23  ;;  %v2236_v20 = vpack.c.bf16 %v446_v18, %v445_v17  ;;  %v429_v21 = vld [vmem:[#allocation2 + $0x270] sm:$0xff]  ;;  %v522_v28 = vld [vmem:[#allocation2 + $0x400] sm:$0xff]  ;;  %v531_v42 = vld [vmem:[#allocation2 + $0x448] sm:$0xff] }
  0x3c   :  { %2165 = vmatpush3.bf16.msra.mxu0 %v2164_v45  ;;  %v536_v50 = vld [vmem:[#allocation2 + $0x470] sm:$0xff]  ;;  %v626_v17 = vld [vmem:[#allocation2 + $0x4d8] sm:$0xff] }
  0x3d   :  { %2189 = vmatpush3.bf16.msra.mxu1 %v2188_v46  ;;  %2166 = vmatprep.subr.bf16.mxu0 %v2439_v39  ;;  %v2210_v46 = vpack.c.bf16 %v416_v40, %v415_v38  ;;  %v528_v38 = vld [vmem:[#allocation2 + $0x430] sm:$0xff] }
  0x3e   :  { %2190 = vmatprep.subr.bf16.mxu1 %v2439_v39  ;;  %v617_v55 = vld [vmem:[#allocation2 + $0x490] sm:$0xff] }
  0x3f   :  { %v621_v62 = vld [vmem:[#allocation2 + $0x4b0] sm:$0xff] }
  0x40   :  { %2168 = vmatpush3.bf16.msra.mxu0 %v2167_v51  ;;  %v435_v51 = vld [vmem:[#allocation2 + $0x2a0] sm:$0xff] }
  0x41   :  { %2192 = vmatpush3.bf16.msra.mxu1 %v2191_v52  ;;  %2169 = vmatprep.subr.bf16.mxu0 %v2439_v39  ;;  %v436_v52 = vld [vmem:[#allocation2 + $0x2a8] sm:$0xff] }
  0x42   :  { %2193 = vmatprep.subr.bf16.mxu1 %v2439_v39  ;;  %v2216_v54 = vpack.c.bf16 %v436_v52, %v435_v51  ;;  %v537_v51 = vld [vmem:[#allocation2 + $0x478] sm:$0xff] }
  0x43   :  { %v2262_v52 = vpack.c.bf16 %v537_v51, %v536_v50  ;;  %v710_v50 = vand.u32 127, %v61_v24 }
  0x44   :  { %2171 = vmatpush3.bf16.msra.mxu0 %v2170_v57  ;;  %v437_v57 = vld [vmem:[#allocation2 + $0x2b0] sm:$0xff] }
  0x45   :  { %2195 = vmatpush3.bf16.msra.mxu1 %v2194_v58  ;;  %2172 = vmatprep.subr.bf16.mxu0 %v2439_v39  ;;  %v438_v58 = vld [vmem:[#allocation2 + $0x2b8] sm:$0xff]  ;;  %vm711_vm1 = vcmp.ge.s32.totalorder %v710_v50, 64  ;;  %vm712_vm2 = vcmp.lt.s32.totalorder %v710_v50, 96 }
  0x46   :  { %2196 = vmatprep.subr.bf16.mxu1 %v2439_v39  ;;  %v2220_v60 = vpack.c.bf16 %v438_v58, %v437_v57  ;;  %v618_v57 = vld [vmem:[#allocation2 + $0x498] sm:$0xff]  ;;  %vm713_vm3 = vmand %vm711_vm1, %vm712_vm2 }
  0x47   :  { %v2268_v58 = vpack.c.bf16 %v618_v57, %v617_v55 }
  0x48   :  { %2174 = vmatpush3.bf16.msra.mxu0 %v2173_v63  ;;  %v439_v63 = vld [vmem:[#allocation2 + $0x2c0] sm:$0xff] }
  0x49   :  { %2198 = vmatpush3.bf16.msra.mxu1 %v2197_v0  ;;  %2175 = vmatprep.subr.bf16.mxu0 %v2439_v39  ;;  %v440_v0 = vld [vmem:[#allocation2 + $0x2c8] sm:$0xff] }
  0x4a   :  { %2199 = vmatprep.subr.bf16.mxu1 %v2439_v39  ;;  %v2224_v2 = vpack.c.bf16 %v440_v0, %v439_v63  ;;  %v622_v63 = vld [vmem:[#allocation2 + $0x4b8] sm:$0xff] }
  0x4b   :  { %v2274_v0 = vpack.c.bf16 %v622_v63, %v621_v62 }
  0x4c   :  { %2177 = vmatpush3.bf16.msra.mxu0 %v2176_v5  ;;  %v442_v5 = vld [vmem:[#allocation2 + $0x2d8] sm:$0xff] }
  0x4d   :  { %2201 = vmatpush3.bf16.msra.mxu1 %v2200_v6  ;;  %2178 = vmatprep.subr.bf16.mxu0 %v2439_v39  ;;  %v2228_v7 = vpack.c.bf16 %v442_v5, %v441_v4  ;;  %v449_v5 = vsub.s32 2, %v2509_v25 }
  0x4e   :  { %2202 = vmatprep.subr.bf16.mxu1 %v2439_v39 }
  0x50   :  { %2180 = vmatpush3.bf16.msra.mxu0 %v2179_v9  ;;  %v426_v9 = vld [vmem:[#allocation2 + $0x258] sm:$0xff] }
  0x51   :  { %2204 = vmatpush3.bf16.msra.mxu1 %v2203_v12  ;;  %2181 = vmatprep.subr.bf16.mxu0 %v2439_v39  ;;  %v2230_v12 = vpack.c.bf16 %v426_v9, %v425_v8 }
  0x52   :  { %2205 = vmatprep.subr.bf16.mxu1 %v2439_v39 }
  0x54   :  { %2183 = vmatpush3.bf16.msra.mxu0 %v2182_v15  ;;  %v428_v15 = vld [vmem:[#allocation2 + $0x268] sm:$0xff] }
  0x55   :  { %2207 = vmatpush3.bf16.msra.mxu1 %v2206_v19  ;;  %2209 = vmatprep.subr.bf16.mxu0 %v2208_v22  ;;  %v2234_v19 = vpack.c.bf16 %v428_v15, %v427_v14  ;;  %v430_v22 = vld [vmem:[#allocation2 + $0x278] sm:$0xff]  ;;  %v625_v15 = vld [vmem:[#allocation2 + $0x4d0] sm:$0xff] }
  0x56   :  { %2240 = vmatprep.subr.bf16.mxu1 %v2439_v39  ;;  %v2238_v26 = vpack.c.bf16 %v430_v22, %v429_v21  ;;  %v2280_v18 = vpack.c.bf16 %v626_v17, %v625_v15  ;;  %v705_v21 = vld [vmem:[#allocation2 + $0x500] sm:$0xff] }
 0x10a   :  { %v1671_v29 = vpop.f32.mrb[0].mxu0 }
 0x10b   :  { %v1706_v31 = vpop.f32.mrb[0].mxu1  ;;  %v1672_v32 = vpop.f32.mrb[1].mxu0 }
 0x10c   :  { %v1673_v34 = vadd.f32 %v1672_v32, %v1671_v29  ;;  %v1707_v35 = vpop.f32.mrb[1].mxu1  ;;  %v523_v29 = vld [vmem:[#allocation2 + $0x408] sm:$0xff]  ;;  %v525_v32 = vld [vmem:[#allocation2 + $0x418] sm:$0xff] }
 0x10d   :  { %v1708_v36 = vadd.f32 %v1707_v35, %v1706_v31  ;;  %v2241_v31 = vpack.c.bf16 %v523_v29, %v522_v28  ;;  %v527_v35 = vld [vmem:[#allocation2 + $0x428] sm:$0xff]  ;;  %v629_v28 = vld [vmem:[#allocation2 + $0x4f0] sm:$0xff]  ;;  %v630_v29 = vld [vmem:[#allocation2 + $0x4f8] sm:$0xff] }
 0x10e   :  { %v132_v41 = vadd.f32 %v1673_v34, %v64_v30  ;;  %v524_v30 = vld [vmem:[#allocation2 + $0x410] sm:$0xff]  ;;  %v526_v34 = vld [vmem:[#allocation2 + $0x420] sm:$0xff] }
 0x10f   :  { %v255_v44 = vadd.f32 %v1708_v36, %v187_v33  ;;  %v2244_v33 = vpack.c.bf16 %v525_v32, %v524_v30  ;;  %v2247_v36 = vpack.c.bf16 %v527_v35, %v526_v34  ;;  %v708_v32 = vld [vmem:[#allocation2 + $0x518] sm:$0xff]  ;;  %v611_v35 = vsub.s32 3, %v2509_v25 }
 0x110   :  { %v135_v45 = vmax.f32 %v132_v41, 0.0  ;;  %v530_v41 = vld [vmem:[#allocation2 + $0x440] sm:$0xff] }
 0x111   :  { %v258_v47 = vmax.f32 %v255_v44, 0.0  ;;  %v2253_v43 = vpack.c.bf16 %v531_v42, %v530_v41  ;;  %v532_v44 = vld [vmem:[#allocation2 + $0x450] sm:$0xff] }
 0x112   :  { %1925 = vmatmul.mubr.f32.vlgmr.msra.gmra.mrb[2].mxu1 %v135_v45  ;;  %v533_v45 = vld [vmem:[#allocation2 + $0x458] sm:$0xff] }
 0x113   :  { %1890 = vmatmul.mubr.f32.vlgmr.msra.gmra.mrb[2].mxu0 %v258_v47  ;;  %1959 = vmatprep.mubr.msk.f32.mxu1 %vm2440_vm0, %v2441_v23  ;;  %v534_v47 = vld [vmem:[#allocation2 + $0x460] sm:$0xff] }
 0x114   :  { %2211 = vmatpush3.bf16.msra.mxu0 %v2210_v46  ;;  %515 = vmatprep.mubr.f32.mxu0 %v2476_v16  ;;  %v424_v16 = vld [vmem:[#allocation2 + $0x248] sm:$0xff]  ;;  %v2256_v46 = vpack.c.bf16 %v533_v45, %v532_v44  ;;  %v633_v45 = vsub.s32 4, %v2509_v25 }
 0x115   :  { %2213 = vmatprep.subr.bf16.mxu0 %v2212_v48  ;;  %v2226_v6 = vpack.c.bf16 %v424_v16, %v423_v3  ;;  %2242 = vmatpush3.bf16.msra.mxu1 %v2241_v31  ;;  %v535_v48 = vld [vmem:[#allocation2 + $0x468] sm:$0xff]  ;;  %v707_v31 = vld [vmem:[#allocation2 + $0x510] sm:$0xff] }
 0x116   :  { %2243 = vmatprep.subr.bf16.mxu1 %v2439_v39  ;;  %v2259_v49 = vpack.c.bf16 %v535_v48, %v534_v47  ;;  %v2545_v34 = vpack.c.bf16 %v708_v32, %v707_v31 }
 0x118   :  { %2215 = vmatpush3.bf16.msra.mxu0 %v2214_v53  ;;  %v615_v53 = vld [vmem:[#allocation2 + $0x480] sm:$0xff] }
 0x119   :  { %2217 = vmatprep.subr.bf16.mxu0 %v2216_v54  ;;  %2245 = vmatpush3.bf16.msra.mxu1 %v2244_v33  ;;  %v616_v54 = vld [vmem:[#allocation2 + $0x488] sm:$0xff]  ;;  %v2286_v33 = vpack.c.bf16 %v630_v29, %v629_v28 }
 0x11a   :  { %2246 = vmatprep.subr.bf16.mxu1 %v2439_v39  ;;  %v2265_v56 = vpack.c.bf16 %v616_v54, %v615_v53 }
 0x11c   :  { %2219 = vmatpush3.bf16.msra.mxu0 %v2218_v59  ;;  %v619_v59 = vld [vmem:[#allocation2 + $0x4a0] sm:$0xff] }
 0x11d   :  { %2221 = vmatprep.subr.bf16.mxu0 %v2220_v60  ;;  %2248 = vmatpush3.bf16.msra.mxu1 %v2247_v36  ;;  %v620_v60 = vld [vmem:[#allocation2 + $0x4a8] sm:$0xff]  ;;  %v612_v36 = vrot.slane %v2512_v27, %v611_v35 }
 0x11e   :  { %2249 = vmatprep.subr.bf16.mxu1 %v2439_v39  ;;  %v2271_v61 = vpack.c.bf16 %v620_v60, %v619_v59 }
 0x120   :  { %2223 = vmatpush3.bf16.msra.mxu0 %v2222_v1 }
 0x121   :  { %2225 = vmatprep.subr.bf16.mxu0 %v2224_v2 }
 0x124   :  { %2227 = vmatpush3.bf16.msra.mxu0 %v2226_v6 }
 0x125   :  { %2229 = vmatprep.subr.bf16.mxu0 %v2228_v7  ;;  %v450_v7 = vrot.slane %v2512_v27, %v449_v5 }
 0x128   :  { %2231 = vmatpush3.bf16.msra.mxu0 %v2230_v12  ;;  %v623_v12 = vld [vmem:[#allocation2 + $0x4c0] sm:$0xff] }
 0x129   :  { %2233 = vmatprep.subr.bf16.mxu0 %v2232_v13  ;;  %v624_v13 = vld [vmem:[#allocation2 + $0x4c8] sm:$0xff] }
 0x12a   :  { %v2277_v14 = vpack.c.bf16 %v624_v13, %v623_v12 }
 0x12c   :  { %2235 = vmatpush3.bf16.msra.mxu0 %v2234_v19  ;;  %v627_v19 = vld [vmem:[#allocation2 + $0x4e0] sm:$0xff] }
 0x12d   :  { %2237 = vmatprep.subr.bf16.mxu0 %v2236_v20  ;;  %v628_v20 = vld [vmem:[#allocation2 + $0x4e8] sm:$0xff] }
 0x12e   :  { %v2283_v22 = vpack.c.bf16 %v628_v20, %v627_v19 }
 0x130   :  { %2239 = vmatpush3.bf16.msra.mxu0 %v2238_v26  ;;  %v706_v26 = vld [vmem:[#allocation2 + $0x508] sm:$0xff] }
 0x131   :  { %2264 = vmatprep.subr.bf16.mxu0 %v2439_v39  ;;  %v2542_v30 = vpack.c.bf16 %v706_v26, %v705_v21 }
 0x133   :  { %516 = vmatmul.mubr.f32.vlgmr.msra.gmra.mrb[4].mxu0 %v2483_v37  ;;  %v529_v37 = vld [vmem:[#allocation2 + $0x438] sm:$0xff] }
 0x134   :  { %1994 = vmatprep.mubr.msk.f32.mxu0 %vm2440_vm0, %v2441_v23  ;;  %v2250_v40 = vpack.c.bf16 %v529_v37, %v528_v38  ;;  %2266 = vmatpush3.bf16.msra.mxu0 %v2265_v56 }
 0x135   :  { %2267 = vmatprep.subr.bf16.mxu0 %v2439_v39 }
 0x136   :  { %2251 = vmatpush3.bf16.msra.mxu1 %v2250_v40 }
 0x137   :  { %2252 = vmatprep.subr.bf16.mxu1 %v2439_v39 }
 0x138   :  { %2269 = vmatpush3.bf16.msra.mxu0 %v2268_v58 }
 0x139   :  { %2270 = vmatprep.subr.bf16.mxu0 %v2439_v39 }
 0x13a   :  { %2254 = vmatpush3.bf16.msra.mxu1 %v2253_v43 }
 0x13b   :  { %2255 = vmatprep.subr.bf16.mxu1 %v2439_v39 }
 0x13c   :  { %2272 = vmatpush3.bf16.msra.mxu0 %v2271_v61 }
 0x13d   :  { %2273 = vmatprep.subr.bf16.mxu0 %v2439_v39 }
 0x13e   :  { %2257 = vmatpush3.bf16.msra.mxu1 %v2256_v46  ;;  %v634_v46 = vrot.slane %v2512_v27, %v633_v45 }
 0x13f   :  { %2258 = vmatprep.subr.bf16.mxu1 %v2439_v39 }
 0x140   :  { %2275 = vmatpush3.bf16.msra.mxu0 %v2274_v0 }
 0x141   :  { %2276 = vmatprep.subr.bf16.mxu0 %v2439_v39 }
 0x142   :  { %2260 = vmatpush3.bf16.msra.mxu1 %v2259_v49 }
 0x143   :  { %2261 = vmatprep.subr.bf16.mxu1 %v2439_v39 }
 0x144   :  { %2278 = vmatpush3.bf16.msra.mxu0 %v2277_v14 }
 0x145   :  { %2279 = vmatprep.subr.bf16.mxu0 %v2439_v39 }
 0x146   :  { %2263 = vmatpush3.bf16.msra.mxu1 %v2262_v52  ;;  %v2442_v52 = vmov 0.5  }
 0x147   :  { %2288 = vmatprep.subr.bf16.mxu1 %v2439_v39  ;;  %v2573_v53 = vsel %vm713_vm3, 1.0, %v2442_v52  ;;  %v2575_v55 = vsel %vm713_vm3, 0.0, %v2442_v52 }
 0x148   :  { %2281 = vmatpush3.bf16.msra.mxu0 %v2280_v18 }
 0x149   :  { %2282 = vmatprep.subr.bf16.mxu0 %v2439_v39 }
 0x14c   :  { %2284 = vmatpush3.bf16.msra.mxu0 %v2283_v22 }
 0x14d   :  { %2285 = vmatprep.subr.bf16.mxu0 %v2439_v39 }
 0x150   :  { %2287 = vmatpush3.bf16.msra.mxu0 %v2286_v33 }
 0x151   :  { %2312 = vmatprep.subr.bf16.mxu0 %v2439_v39 }
 0x1e5   :  { %v411_v1 = vpop.f32.mrb[2].mxu1 }
 0x1e6   :  { %v341_v2 = vpop.f32.mrb[2].mxu0  ;;  %v1926_v3 = vpop.f32.mrb[3].mxu1 }
 0x1e7   :  { %v412_v16 = vadd.f32 %v411_v1, %v341_v2  ;;  %v1891_v4 = vpop.f32.mrb[3].mxu0 }
 0x206   :  { %v1775_v6 = vpop.f32.mrb[4].mxu0 }
 0x207   :  { %v1776_v8 = vpop.f32.mrb[5].mxu0 }
 0x208   :  { %v1777_v9 = vadd.f32 %v1776_v8, %v1775_v6 }
 0x20a   :  { %v518_v10 = vadd.f32 %v1777_v9, %v450_v7 }
 0x20c   :  { %v521_v11 = vmax.f32 %v518_v10, 0.0 }
 0x20e   :  { %1960 = vmatmul.mubr.f32.vlgmr.msra.gmra.mrb[4].mxu1 %v521_v11 }
 0x20f   :  { %2005 = vmatprep.mubr.msk.f32.mxu1 %vm2440_vm0, %v2441_v23  ;;  %2290 = vmatpush3.bf16.msra.mxu1 %v2542_v30 }
 0x210   :  { %2291 = vmatprep.subr.bf16.mxu1 %v2439_v39 }
 0x213   :  { %2293 = vmatpush3.bf16.msra.mxu1 %v2545_v34 }
 0x214   :  { %2294 = vmatprep.subr.bf16.mxu1 %v2439_v39 }
 0x216   :  { %2006 = vmatmul.mubr.f32.vlgmr.msra.gmra.mrb[6].mxu1 %v2441_v23 }
 0x217   :  { %2296 = vmatpush3.bf16.msra.mxu1 %v2542_v30  ;;  %2016 = vmatprep.mubr.msk.f32.mxu1 %vm2440_vm0, %v2441_v23 }
 0x218   :  { %2297 = vmatprep.subr.bf16.mxu1 %v2439_v39 }
 0x21b   :  { %2299 = vmatpush3.bf16.msra.mxu1 %v2545_v34 }
 0x21c   :  { %2300 = vmatprep.subr.bf16.mxu1 %v2439_v39 }
 0x2e1   :  { %v604_v38 = vpop.f32.mrb[4].mxu1 }
 0x2e2   :  { %v608_v37 = vadd.f32 %v604_v38, %v412_v16  ;;  %v1961_v40 = vpop.f32.mrb[5].mxu1 }
 0x2e4   :  { %v613_v41 = vadd.f32 %v612_v36, %v608_v37 }
 0x2e6   :  { %2352 = vtanh.f32 %v613_v41 }
 0x2e9   :  { %v786_v43 = vpop.f32.mrb[6].mxu1 }
 0x2ea   :  { %v2007_v44 = vpop.f32.mrb[7].mxu1 }
 0x2f0   :  { %v2353_v42 = vpop.eup %2352 }
 0x2f1   :  { %1995 = vmatmul.mubr.f32.vlgmr.msra.gmra.mrb[6].mxu0 %v2353_v42 }
 0x2f2   :  { %2314 = vmatpush3.bf16.msra.mxu0 %v2542_v30  ;;  %2049 = vmatprep.mubr.msk.f32.mxu0 %vm2440_vm0, %v2441_v23 }
 0x2f3   :  { %2315 = vmatprep.subr.bf16.mxu0 %v2439_v39 }
 0x2f6   :  { %2317 = vmatpush3.bf16.msra.mxu0 %v2545_v34 }
 0x2f7   :  { %2324 = vmatprep.subr.bf16.mxu0 %v2439_v39 }
 0x3c4   :  { %v701_v47 = vpop.f32.mrb[6].mxu0 }
 0x3c5   :  { %v2569_v48 = vadd.f32 %v701_v47, %v634_v46  ;;  %v1996_v49 = vpop.f32.mrb[7].mxu0 }
 0x3c7   :  { %v790_v51 = vadd.f32 %v786_v43, %v2569_v48 }
 0x3c9   :  { %2354 = vtanh.f32 %v790_v51 }
 0x3d3   :  { %v2355_v54 = vpop.eup %2354 }
 0x3d4   :  { %v792_v25 = vmul.f32 %v2355_v54, %v2573_v53 }
 0x3d6   :  { %v793_v56 = vadd.f32 %v792_v25, %v2575_v55 }
 0x3d8   :  { %796 = vrot.lane.b32.xlu0 %v793_v56, %s2443_s0  ;;  %v794_v58 = vmul.f32 0.0, %v793_v56 }
 0x44a   :  { %v797_v24 = vpop.permute.xlu0 %796 }
 0x44b   :  { %v799_v57 = vmul.f32 %v797_v24, %v793_v56 }
 0x44d   :  { %801 = vrot.lane.b32.xlu0 %v799_v57, %s2444_s26 }
 0x4bf   :  { %v802_v59 = vpop.permute.xlu0 %801 }
 0x4c0   :  { %v804_v60 = vadd.f32 %v802_v59, %v794_v58 }
 0x4c2   :  { %2356 = vtanh.f32 %v804_v60  ;;  %v894_v9 = vrot.slane %v804_v60, 7 }
 0x4cc   :  { %v2357_v61 = vpop.eup %2356 }
 0x4cd   :  { %807 = vrot.lane.b32.xlu1 %v2357_v61, %s2443_s0 }
 0x53f   :  { %v808_v62 = vpop.permute.xlu1 %807 }
 0x540   :  { %v810_v63 = vmul.f32 %v808_v62, %v793_v56 }
 0x542   :  { %812 = vrot.lane.b32.xlu1 %v810_v63, %s2444_s26 }
 0x5b4   :  { %v813_v0 = vpop.permute.xlu1 %812 }
 0x5b5   :  { %2017 = vmatmul.mubr.msk.f32.vlgmr.msra.gmra.mrb[8].mxu1 %vm716_vm4, %v813_v0 }
 0x5b6   :  { %2302 = vmatpush3.bf16.msra.mxu1 %v2542_v30  ;;  %2027 = vmatprep.mubr.msk.f32.mxu1 %vm2440_vm0, %v2441_v23 }
 0x5b7   :  { %2303 = vmatprep.subr.bf16.mxu1 %v2439_v39 }
 0x5ba   :  { %2305 = vmatpush3.bf16.msra.mxu1 %v2545_v34 }
 0x5bb   :  { %2306 = vmatprep.subr.bf16.mxu1 %v2439_v39 }
 0x688   :  { %v882_v1 = vpop.f32.mrb[8].mxu1 }
 0x689   :  { %v887_v2 = vrot.slane %v882_v1, 7  ;;  %v2018_v3 = vpop.f32.mrb[9].mxu1 }
 0x68b   :  { %v889_v16 = vadd.f32 %v887_v2, %v2569_v48 }
 0x68d   :  { %2358 = vtanh.f32 %v889_v16 }
 0x697   :  { %v2359_v4 = vpop.eup %2358 }
 0x698   :  { %v891_v5 = vmul.f32 %v2359_v4, %v2573_v53 }
 0x69a   :  { %v892_v6 = vadd.f32 %v891_v5, %v2575_v55 }
 0x69c   :  { %898 = vrot.lane.b32.xlu0 %v892_v6, %s2443_s0  ;;  %v896_v10 = vmul.f32 %v894_v9, %v892_v6 }
 0x70e   :  { %v899_v7 = vpop.permute.xlu0 %898 }
 0x70f   :  { %v901_v8 = vmul.f32 %v899_v7, %v892_v6 }
 0x711   :  { %903 = vrot.lane.b32.xlu1 %v901_v8, %s2444_s26 }
 0x783   :  { %v904_v11 = vpop.permute.xlu1 %903 }
 0x784   :  { %v906_v12 = vadd.f32 %v904_v11, %v896_v10 }
 0x786   :  { %2360 = vtanh.f32 %v906_v12  ;;  %v997_v33 = vrot.slane %v906_v12, 7 }
 0x790   :  { %v2361_v13 = vpop.eup %2360 }
 0x791   :  { %909 = vrot.lane.b32.xlu0 %v2361_v13, %s2443_s0 }
 0x803   :  { %v910_v14 = vpop.permute.xlu0 %909 }
 0x804   :  { %v912_v15 = vmul.f32 %v910_v14, %v892_v6 }
 0x806   :  { %v914_v17 = vrot.slane %v912_v15, 1 }
 0x808   :  { %915 = vrot.lane.b32.xlu1 %v914_v17, %s2444_s26 }
 0x87a   :  { %v916_v18 = vpop.permute.xlu1 %915 }
 0x87b   :  { %2028 = vmatmul.mubr.msk.f32.vlgmr.msra.gmra.mrb[10].mxu1 %vm716_vm4, %v916_v18 }
 0x87c   :  { %2308 = vmatpush3.bf16.msra.mxu1 %v2542_v30  ;;  %2038 = vmatprep.mubr.msk.f32.mxu1 %vm2440_vm0, %v2441_v23 }
 0x87d   :  { %2309 = vmatprep.subr.bf16.mxu1 %v2439_v39 }
 0x880   :  { %2311 = vmatpush3.bf16.msra.mxu1 %v2545_v34 }
 0x881   :  { %2318 = vmatprep.subr.bf16.mxu1 %v2439_v39 }
 0x94e   :  { %v985_v19 = vpop.f32.mrb[10].mxu1 }
 0x94f   :  { %v990_v20 = vrot.slane %v985_v19, 6  ;;  %v2029_v21 = vpop.f32.mrb[11].mxu1 }
 0x951   :  { %v992_v22 = vadd.f32 %v990_v20, %v2569_v48 }
 0x953   :  { %2362 = vtanh.f32 %v992_v22 }
 0x95d   :  { %v2363_v26 = vpop.eup %2362 }
 0x95e   :  { %v994_v28 = vmul.f32 %v2363_v26, %v2573_v53 }
 0x960   :  { %v995_v29 = vadd.f32 %v994_v28, %v2575_v55 }
 0x962   :  { %1001 = vrot.lane.b32.xlu0 %v995_v29, %s2443_s0  ;;  %v999_v35 = vmul.f32 %v997_v33, %v995_v29 }
 0x9d4   :  { %v1002_v31 = vpop.permute.xlu0 %1001 }
 0x9d5   :  { %v1004_v32 = vmul.f32 %v1002_v31, %v995_v29 }
 0x9d7   :  { %1006 = vrot.lane.b32.xlu1 %v1004_v32, %s2444_s26 }
 0xa49   :  { %v1007_v36 = vpop.permute.xlu1 %1006 }
 0xa4a   :  { %v1009_v38 = vadd.f32 %v1007_v36, %v999_v35 }
 0xa4c   :  { %2364 = vtanh.f32 %v1009_v38  ;;  %v1100_v25 = vrot.slane %v1009_v38, 7 }
 0xa56   :  { %v2365_v37 = vpop.eup %2364 }
 0xa57   :  { %1012 = vrot.lane.b32.xlu0 %v2365_v37, %s2443_s0 }
 0xac9   :  { %v1013_v40 = vpop.permute.xlu0 %1012 }
 0xaca   :  { %v1015_v41 = vmul.f32 %v1013_v40, %v995_v29 }
 0xacc   :  { %v1017_v42 = vrot.slane %v1015_v41, 2 }
 0xace   :  { %1018 = vrot.lane.b32.xlu1 %v1017_v42, %s2444_s26 }
 0xb40   :  { %v1019_v43 = vpop.permute.xlu1 %1018 }
 0xb41   :  { %2039 = vmatmul.mubr.msk.f32.vlgmr.msra.gmra.mrb[12].mxu1 %vm716_vm4, %v1019_v43 }
 0xb42   :  { %2320 = vmatpush3.bf16.msra.mxu1 %v2542_v30  ;;  %2060 = vmatprep.mubr.msk.f32.mxu1 %vm2440_vm0, %v2441_v23 }
 0xb43   :  { %2321 = vmatprep.subr.bf16.mxu1 %v2439_v39 }
 0xb46   :  { %2323 = vmatpush3.bf16.msra.mxu1 %v2545_v34 }
 0xb47   :  { %2330 = vmatprep.subr.bf16.mxu1 %v2439_v39 }
 0xc14   :  { %v1088_v44 = vpop.f32.mrb[12].mxu1 }
 0xc15   :  { %v1093_v45 = vrot.slane %v1088_v44, 5  ;;  %v2040_v46 = vpop.f32.mrb[13].mxu1 }
 0xc17   :  { %v1095_v47 = vadd.f32 %v1093_v45, %v2569_v48 }
 0xc19   :  { %2366 = vtanh.f32 %v1095_v47 }
 0xc23   :  { %v2367_v49 = vpop.eup %2366 }
 0xc24   :  { %v1097_v50 = vmul.f32 %v2367_v49, %v2573_v53 }
 0xc26   :  { %v1098_v51 = vadd.f32 %v1097_v50, %v2575_v55 }
 0xc28   :  { %1104 = vrot.lane.b32.xlu0 %v1098_v51, %s2443_s0  ;;  %v1102_v56 = vmul.f32 %v1100_v25, %v1098_v51 }
 0xc9a   :  { %v1105_v52 = vpop.permute.xlu0 %1104 }
 0xc9b   :  { %v1107_v54 = vmul.f32 %v1105_v52, %v1098_v51 }
 0xc9d   :  { %1109 = vrot.lane.b32.xlu1 %v1107_v54, %s2444_s26 }
 0xd0f   :  { %v1110_v24 = vpop.permute.xlu1 %1109 }
 0xd10   :  { %v1112_v57 = vadd.f32 %v1110_v24, %v1102_v56 }
 0xd12   :  { %2368 = vtanh.f32 %v1112_v57  ;;  %v1203_v7 = vrot.slane %v1112_v57, 7 }
 0xd1c   :  { %v2369_v58 = vpop.eup %2368 }
 0xd1d   :  { %1115 = vrot.lane.b32.xlu0 %v2369_v58, %s2443_s0 }
 0xd8f   :  { %v1116_v59 = vpop.permute.xlu0 %1115 }
 0xd90   :  { %v1118_v60 = vmul.f32 %v1116_v59, %v1098_v51 }
 0xd92   :  { %v1120_v61 = vrot.slane %v1118_v60, 3 }
 0xd94   :  { %1121 = vrot.lane.b32.xlu1 %v1120_v61, %s2444_s26 }
 0xe06   :  { %v1122_v62 = vpop.permute.xlu1 %1121 }
 0xe07   :  { %2050 = vmatmul.mubr.msk.f32.vlgmr.msra.gmra.mrb[8].mxu0 %vm716_vm4, %v1122_v62 }
 0xe08   :  { %2326 = vmatpush3.bf16.msra.mxu0 %v2542_v30  ;;  %2071 = vmatprep.mubr.msk.f32.mxu0 %vm2440_vm0, %v2441_v23 }
 0xe09   :  { %2327 = vmatprep.subr.bf16.mxu0 %v2439_v39 }
 0xe0c   :  { %2329 = vmatpush3.bf16.msra.mxu0 %v2545_v34 }
 0xe0d   :  { %2336 = vmatprep.subr.bf16.mxu0 %v2439_v39 }
 0xeda   :  { %v1191_v63 = vpop.f32.mrb[8].mxu0 }
 0xedb   :  { %v1196_v0 = vrot.slane %v1191_v63, 4  ;;  %v2051_v1 = vpop.f32.mrb[9].mxu0 }
 0xedd   :  { %v1198_v2 = vadd.f32 %v1196_v0, %v2569_v48 }
 0xedf   :  { %2370 = vtanh.f32 %v1198_v2 }
 0xee9   :  { %v2371_v3 = vpop.eup %2370 }
 0xeea   :  { %v1200_v16 = vmul.f32 %v2371_v3, %v2573_v53 }
 0xeec   :  { %v1201_v4 = vadd.f32 %v1200_v16, %v2575_v55 }
 0xeee   :  { %1207 = vrot.lane.b32.xlu0 %v1201_v4, %s2443_s0  ;;  %v1205_v8 = vmul.f32 %v1203_v7, %v1201_v4  ;;  %v1532_v7 = vld [vmem:[#allocation2 + $0x528] sm:$0xff] }
 0xf60   :  { %v1208_v5 = vpop.permute.xlu0 %1207 }
 0xf61   :  { %v1210_v6 = vmul.f32 %v1208_v5, %v1201_v4 }
 0xf63   :  { %1212 = vrot.lane.b32.xlu1 %v1210_v6, %s2444_s26  ;;  %v1531_v6 = vld [vmem:[#allocation2 + $0x520] sm:$0xff] }
 0xfd5   :  { %v1213_v9 = vpop.permute.xlu1 %1212 }
 0xfd6   :  { %v1215_v10 = vadd.f32 %v1213_v9, %v1205_v8  ;;  %v2337_v8 = vpack.c.bf16 %v1532_v7, %v1531_v6  ;;  %v1534_v9 = vld [vmem:[#allocation2 + $0x538] sm:$0xff] }
 0xfd8   :  { %2372 = vtanh.f32 %v1215_v10  ;;  %v1306_v29 = vrot.slane %v1215_v10, 7 }
 0xfe2   :  { %v2373_v11 = vpop.eup %2372 }
 0xfe3   :  { %1218 = vrot.lane.b32.xlu0 %v2373_v11, %s2443_s0 }
0x1055   :  { %v1219_v12 = vpop.permute.xlu0 %1218 }
0x1056   :  { %v1221_v13 = vmul.f32 %v1219_v12, %v1201_v4 }
0x1058   :  { %v1223_v14 = vrot.slane %v1221_v13, 4 }
0x105a   :  { %1224 = vrot.lane.b32.xlu1 %v1223_v14, %s2444_s26  ;;  %v1540_v14 = vrot.slane %v2512_v27, 5 }
0x10cc   :  { %v1225_v15 = vpop.permute.xlu1 %1224 }
0x10cd   :  { %2061 = vmatmul.mubr.msk.f32.vlgmr.msra.gmra.mrb[14].mxu1 %vm716_vm4, %v1225_v15 }
0x10ce   :  { %2332 = vmatpush3.bf16.msra.mxu1 %v2542_v30  ;;  %2082 = vmatprep.mubr.msk.f32.mxu1 %vm2440_vm0, %v2441_v23 }
0x10cf   :  { %2333 = vmatprep.subr.bf16.mxu1 %v2439_v39 }
0x10d2   :  { %2335 = vmatpush3.bf16.msra.mxu1 %v2545_v34 }
0x11a0   :  { %v1294_v17 = vpop.f32.mrb[14].mxu1 }
0x11a1   :  { %v1299_v18 = vrot.slane %v1294_v17, 3  ;;  %v2062_v19 = vpop.f32.mrb[15].mxu1 }
0x11a3   :  { %v1301_v20 = vadd.f32 %v1299_v18, %v2569_v48 }
0x11a5   :  { %2374 = vtanh.f32 %v1301_v20 }
0x11af   :  { %v2375_v21 = vpop.eup %2374 }
0x11b0   :  { %v1303_v22 = vmul.f32 %v2375_v21, %v2573_v53 }
0x11b2   :  { %v1304_v26 = vadd.f32 %v1303_v22, %v2575_v55 }
0x11b4   :  { %1310 = vrot.lane.b32.xlu0 %v1304_v26, %s2443_s0  ;;  %v1308_v31 = vmul.f32 %v1306_v29, %v1304_v26 }
0x1226   :  { %v1311_v30 = vpop.permute.xlu0 %1310 }
0x1227   :  { %v1313_v28 = vmul.f32 %v1311_v30, %v1304_v26 }
0x1229   :  { %1315 = vrot.lane.b32.xlu1 %v1313_v28, %s2444_s26 }
0x129b   :  { %v1316_v34 = vpop.permute.xlu1 %1315 }
0x129c   :  { %v1318_v32 = vadd.f32 %v1316_v34, %v1308_v31 }
0x129e   :  { %2376 = vtanh.f32 %v1318_v32  ;;  %v1409_v50 = vrot.slane %v1318_v32, 7 }
0x12a8   :  { %v2377_v33 = vpop.eup %2376 }
0x12a9   :  { %1321 = vrot.lane.b32.xlu0 %v2377_v33, %s2443_s0 }
0x131b   :  { %v1322_v35 = vpop.permute.xlu0 %1321 }
0x131c   :  { %v1324_v36 = vmul.f32 %v1322_v35, %v1304_v26 }
0x131e   :  { %v1326_v38 = vrot.slane %v1324_v36, 5 }
0x1320   :  { %1327 = vrot.lane.b32.xlu1 %v1326_v38, %s2444_s26 }
0x1392   :  { %v1328_v37 = vpop.permute.xlu1 %1327 }
0x1393   :  { %2072 = vmatmul.mubr.msk.f32.vlgmr.msra.gmra.mrb[10].mxu0 %vm716_vm4, %v1328_v37 }
0x1394   :  { %2093 = vmatprep.mubr.msk.f32.mxu0 %vm2440_vm0, %v2441_v23  ;;  %2338 = vmatpush3.bf16.msra.mxu0 %v2337_v8 }
0x1395   :  { %2339 = vmatprep.subr.bf16.mxu0 %v2439_v39 }
0x1466   :  { %v1397_v40 = vpop.f32.mrb[10].mxu0 }
0x1467   :  { %v1402_v41 = vrot.slane %v1397_v40, 2  ;;  %v2073_v42 = vpop.f32.mrb[11].mxu0 }
0x1469   :  { %v1404_v43 = vadd.f32 %v1402_v41, %v2569_v48 }
0x146b   :  { %2378 = vtanh.f32 %v1404_v43 }
0x1475   :  { %v2379_v44 = vpop.eup %2378 }
0x1476   :  { %v1406_v45 = vmul.f32 %v2379_v44, %v2573_v53 }
0x1478   :  { %v1407_v46 = vadd.f32 %v1406_v45, %v2575_v55 }
0x147a   :  { %1413 = vrot.lane.b32.xlu0 %v1407_v46, %s2443_s0  ;;  %v1411_v51 = vmul.f32 %v1409_v50, %v1407_v46 }
0x14ec   :  { %v1414_v47 = vpop.permute.xlu0 %1413 }
0x14ed   :  { %v1416_v49 = vmul.f32 %v1414_v47, %v1407_v46 }
0x14ef   :  { %1418 = vrot.lane.b32.xlu1 %v1416_v49, %s2444_s26 }
0x1561   :  { %v1419_v23 = vpop.permute.xlu1 %1418 }
0x1562   :  { %v1421_v52 = vadd.f32 %v1419_v23, %v1411_v51 }
0x1564   :  { %2380 = vtanh.f32 %v1421_v52  ;;  %v1512_v3 = vrot.slane %v1421_v52, 7 }
0x156e   :  { %v2381_v54 = vpop.eup %2380 }
0x156f   :  { %1424 = vrot.lane.b32.xlu0 %v2381_v54, %s2443_s0 }
0x15e1   :  { %v1425_v25 = vpop.permute.xlu0 %1424 }
0x15e2   :  { %v1427_v56 = vmul.f32 %v1425_v25, %v1407_v46 }
0x15e4   :  { %v1429_v24 = vrot.slane %v1427_v56, 6 }
0x15e6   :  { %1430 = vrot.lane.b32.xlu1 %v1429_v24, %s2444_s26 }
0x1658   :  { %v1431_v57 = vpop.permute.xlu1 %1430 }
0x1659   :  { %2083 = vmatmul.mubr.msk.f32.vlgmr.msra.gmra.mrb[16].mxu1 %vm716_vm4, %v1431_v57 }
0x172c   :  { %v1500_v58 = vpop.f32.mrb[16].mxu1 }
0x172d   :  { %v1505_v59 = vrot.slane %v1500_v58, 1  ;;  %v2084_v60 = vpop.f32.mrb[17].mxu1 }
0x172f   :  { %v1507_v61 = vadd.f32 %v1505_v59, %v2569_v48  ;;  %v1533_v48 = vld [vmem:[#allocation2 + $0x530] sm:$0xff] }
0x1731   :  { %2382 = vtanh.f32 %v1507_v61 }
0x173b   :  { %v2383_v62 = vpop.eup %2382 }
0x173c   :  { %v1509_v63 = vmul.f32 %v2383_v62, %v2573_v53  ;;  %v2340_v53 = vpack.c.bf16 %v1534_v9, %v1533_v48 }
0x173e   :  { %v1510_v0 = vadd.f32 %v1509_v63, %v2575_v55  ;;  %2341 = vmatpush3.bf16.msra.mxu0 %v2340_v53 }
0x1740   :  { %1516 = vrot.lane.b32.xlu0 %v1510_v0, %s2443_s0  ;;  %v1514_v16 = vmul.f32 %v1512_v3, %v1510_v0 }
0x17b2   :  { %v1517_v1 = vpop.permute.xlu0 %1516 }
0x17b3   :  { %v1519_v2 = vmul.f32 %v1517_v1, %v1510_v0 }
0x17b5   :  { %1521 = vrot.lane.b32.xlu1 %v1519_v2, %s2444_s26 }
0x1827   :  { %v1522_v4 = vpop.permute.xlu1 %1521 }
0x1828   :  { %v1524_v5 = vadd.f32 %v1522_v4, %v1514_v16 }
0x182a   :  { %2384 = vtanh.f32 %v1524_v5 }
0x1834   :  { %v2385_v55 = vpop.eup %2384 }
0x1835   :  { %1527 = vrot.lane.b32.xlu0 %v2385_v55, %s2443_s0 }
0x18a7   :  { %v1528_v10 = vpop.permute.xlu0 %1527 }
0x18a8   :  { %v1530_v11 = vmul.f32 %v1528_v10, %v1510_v0 }
0x18aa   :  { %v1536_v12 = vrot.slane %v1530_v11, 7 }
0x18ac   :  { %1537 = vrot.lane.b32.xlu1 %v1536_v12, %s2444_s26 }
0x191e   :  { %v1538_v13 = vpop.permute.xlu1 %1537 }
0x191f   :  { %2094 = vmatmul.mubr.msk.f32.vlgmr.msra.gmra.mrb[12].mxu0 %vm716_vm4, %v1538_v13 }
0x19f2   :  { %v1610_v15 = vpop.f32.mrb[12].mxu0 }
0x19f3   :  { %v1611_v17 = vadd.f32 %v1610_v15, %v1540_v14  ;;  %v2095_v18 = vpop.f32.mrb[13].mxu0 }
0x19f5   :  { %2386 = vtanh.f32 %v1611_v17 }
0x19ff   :  { %v2387_v39 = vpop.eup %2386 }
0x1a00   :  { %1615 = vst [vmem:[#allocation5] sm:$0x1] %v2387_v39 }
0x1a01   :  { %2421 = shalt.err (!%p2418_p12)
}
0x1a02   :  { %s2422_s5 = scalar_lea.hbm %s2687_s2, 16 }
0x1a03   :  { %p2423_p13 = scmp.ne.s32.totalorder %s2687_s2, %s2422_s5  ;;  %p2426_p0 = scmp.lt.u32.totalorder %s2422_s5, %s2687_s2 }
0x1a05   :  { %p2428_p1 = pnand %p2426_p0, %p2423_p13 }
0x1a07   :  { %2431 = shalt.err (!%p2428_p1)
}
0x1a08   :  { %1625 = dma.vmem_to_hbm [thread:$0]  %s1623_s28, 16, %s2687_s2, [#allocation4]  }
0x1a09   :  { %2434 = dma.done.wait [#allocation4], 16  }
0x1a0a   :  { %2435 = vsyncadd [#allocation4], 4294967280 }
0x1a0b   :  { %1629 = vsyncpa [#allocation3], 1 }
0x1a0c   :  { %1630 = vsyncpa [#allocation4], 1 }

</bundles_post_ra>
